<compile_context>
chip_gen: v7x
topology: tpu7x:2x2x1
jax: 0.10.0
libtpu: 0.0.40
codegen_flags: <defaults>
</compile_context>

<pallas_src>
import functools
import math

import jax
import jax.numpy as jnp
from jax.experimental import pallas as pl
from jax.experimental.pallas import tpu as pltpu


def _residual_block_kernel(*refs, C, dilation, Tt, inv_sqrt2, has_cond):
    """Fused ResidualBlock for one (batch, time-tile) grid step.

    refs (conditional path):
      x_ref     : (1, C, Tt)        bf16 audio tile
      halo_ref  : (1, nt, C, 2*dil) bf16 per-batch resident halo of y (0 at seq edges)
      dstep_ref : (1, C, 1)         bf16 per-batch diffusion projection
      cond_ref  : (1, n_mels, Tt)   bf16 conditioner tile            [only if has_cond]
      wbig_ref  : (2C, 3C[+n_mels]) bf16 fused conv-taps [+ cond proj] weight
      wout_ref  : (2C, C)           bf16 1x1 output projection
      bz_ref    : (2C, 1)           f32  bconv [+ bcond]
      bout_ref  : (2C, 1)           f32
      res_ref   : (1, C, Tt)        f32  (x + residual) / sqrt(2)
      skip_ref  : (1, C, Tt)        f32  skip
    """
    if has_cond:
        (x_ref, halo_ref, dstep_ref, cond_ref,
         wbig_ref, wout_ref, bz_ref, bout_ref, res_ref, skip_ref) = refs
    else:
        (x_ref, halo_ref, dstep_ref,
         wbig_ref, wout_ref, bz_ref, bout_ref, res_ref, skip_ref) = refs
        cond_ref = None

    d = dilation
    i = pl.program_id(1)

    x = x_ref[0]                                   # (C, Tt) bf16
    y = x + dstep_ref[0]                           # (C, Tt) bf16, (C,1) broadcast over lanes
    halo = halo_ref[0, i]                          # (C, 2d) bf16, already y-valued / zero at edges

    # +-dilation shifted views of y; the halo supplies the cross-tile columns.
    y_left = jnp.concatenate([halo[:, :d], y[:, :Tt - d]], axis=1)    # y[:, t - d]
    y_right = jnp.concatenate([y[:, d:], halo[:, d:]], axis=1)        # y[:, t + d]

    pieces = [y_left, y, y_right]
    if has_cond:
        pieces.append(cond_ref[0])                                    # (n_mels, Tt)
    stacked = jnp.concatenate(pieces, axis=0)                         # (3C[+n_mels], Tt) bf16

    # One fused MXU matmul for the dilated conv (+ conditioner projection), f32 acc.
    z = jnp.dot(wbig_ref[...], stacked, preferred_element_type=jnp.float32)
    z = z + bz_ref[...]                                               # (2C, Tt) f32

    gate = z[:C]
    filt = z[C:]
    # sigmoid via tanh: keeps the whole nonlinearity on the EUP (no f32 divide on VALU).
    g = (0.5 * jnp.tanh(0.5 * gate) + 0.5) * jnp.tanh(filt)           # f32

    out = jnp.dot(wout_ref[...], g.astype(wout_ref.dtype),
                  preferred_element_type=jnp.float32) + bout_ref[...]

    # Dense, lane-dense full-slab stores.
    res_ref[0] = ((x + out[:C]) * inv_sqrt2).astype(res_ref.dtype)
    skip_ref[0] = out[C:].astype(skip_ref.dtype)


def _default_time_tile(T):
    # Big lane-dense tiles: per-grid-step overhead ~0.35us and the HBM roofline
    # needs >=512-1024 wide slabs; 4096 is the sweet spot, capped for v7x VMEM.
    for cand in (4096, 2048, 1024, 512, 256, 128):
        if T % cand == 0:
            return cand
    return T


def _vmem_limit_bytes(C, n_mels, Tt, d, nt, has_cond):
    """Rough per-step VMEM footprint (double-buffered streams + temps), 2x headroom."""
    bf, f4 = 2, 4
    K = 3 * C + (n_mels if has_cond else 0)
    stream_in = 2 * Tt * (C * bf + (n_mels * bf if has_cond else 0))     # x (+cond), double-buffered
    stream_out = 2 * Tt * (2 * C * f4)                                   # res + skip f32, double-buffered
    weights = 2 * C * (K + C) * bf + 4 * C * f4
    halo = nt * C * max(2 * d, 128) * bf                                 # lane-padded resident halo
    temps = Tt * (3 * C * bf + K * bf + 2 * (2 * C) * f4 + C * f4)       # y_l/y_r, stacked, z/out, g
    est = stream_in + stream_out + weights + halo + temps
    # >=32 MiB so it always exceeds the scoped defaults (v5e: 16 MiB); cap at
    # 64 MiB so the request stays within v7x's physical VMEM per TensorCore.
    return int(min(64 * 2 ** 20, max(32 * 2 ** 20, 2 * est)))


def residual_block_forward(x, diffusion_step, conditioner, params, *,
                           dilation, time_tile=None):
    """Pallas TPU forward of the DiffWave ResidualBlock.

    x:              (B, C, T) float32
    diffusion_step: (B, 512)  float32
    conditioner:    (B, n_mels, T) float32, or None for the uncond branch
    params (conditional):   (Wd, bd, Wconv, bconv, Wcond, bcond, Wout, bout)
    params (unconditional): (Wd, bd, Wconv, bconv, Wout, bout)
    Returns ((x + residual) / sqrt(2), skip), each (B, C, T) float32.
    """
    has_cond = conditioner is not None
    if has_cond:
        Wd, bd, Wconv, bconv, Wcond, bcond, Wout, bout = params
    else:
        Wd, bd, Wconv, bconv, Wout, bout = params
        Wcond = bcond = None

    f32, bf16 = jnp.float32, jnp.bfloat16
    B, C, T = x.shape
    C2 = 2 * C
    d = int(dilation)

    Tt = int(time_tile) if time_tile is not None else _default_time_tile(T)
    assert T % Tt == 0, "T must be divisible by the time tile"
    assert Tt == T or Tt % 128 == 0, "time tile must be the full length or a multiple of 128"
    assert 0 < d < Tt, "dilation must be smaller than the time tile"
    assert C % 8 == 0, "residual_channels should be a multiple of 8 for TPU layout"
    nt = T // Tt

    # Diffusion projection: tiny (B,512)@(512,C) GEMM, time-independent -> plain JAX.
    dproj = diffusion_step.astype(f32) @ Wd.astype(f32).T + bd.astype(f32)      # (B, C)

    # Stream activations in bf16; all accumulation stays f32 inside the kernel.
    x_bf = x.astype(bf16)
    dproj_bf = dproj.astype(bf16)

    # Per-tile halo of y = x + dproj: the `dilation` columns immediately left and
    # right of each tile (zero where the conv's zero padding applies), built with
    # a reshape gather -- no full-x pad copy, no O(nt) python loop.
    xr = x_bf.reshape(B, C, nt, Tt)
    dcol = dproj_bf[:, :, None, None]
    left_y = xr[..., :d] + dcol                    # (B, C, nt, d): first d cols of each tile (as y)
    right_y = xr[..., Tt - d:] + dcol              # (B, C, nt, d): last d cols of each tile (as y)
    zeros = jnp.zeros((B, C, 1, d), bf16)
    halo_l = jnp.concatenate([zeros, right_y[:, :, :nt - 1]], axis=2)   # y cols [i*Tt-d, i*Tt)
    halo_r = jnp.concatenate([left_y[:, :, 1:], zeros], axis=2)         # y cols [(i+1)*Tt, +d)
    halo = jnp.concatenate([halo_l, halo_r], axis=-1)                   # (B, C, nt, 2d)
    halo = jnp.transpose(halo, (0, 2, 1, 3))                            # (B, nt, C, 2d)

    # Fused z-stage weight: conv taps (t-d, t, t+d) [+ 1x1 conditioner proj] along K.
    taps = [Wconv[:, :, 0], Wconv[:, :, 1], Wconv[:, :, 2]]
    bz = bconv.astype(f32)
    if has_cond:
        taps.append(Wcond[:, :, 0])
        bz = bz + bcond.astype(f32)
    wbig = jnp.concatenate(taps, axis=1).astype(bf16)                   # (2C, 3C[+n_mels])
    K = wbig.shape[1]
    wout = Wout[:, :, 0].astype(bf16)                                   # (2C, C)
    bz = bz.reshape(C2, 1)
    bo = bout.astype(f32).reshape(C2, 1)

    kernel = functools.partial(_residual_block_kernel, C=C, dilation=d, Tt=Tt,
                               inv_sqrt2=1.0 / math.sqrt(2.0), has_cond=has_cond)

    in_specs = [
        pl.BlockSpec((1, C, Tt), lambda b, i: (b, 0, i)),               # x tile (bf16)
        pl.BlockSpec((1, nt, C, 2 * d), lambda b, i: (b, 0, 0, 0)),     # per-batch resident halo
        pl.BlockSpec((1, C, 1), lambda b, i: (b, 0, 0)),                # diffusion projection
    ]
    operands = [x_bf, halo, dproj_bf[:, :, None]]
    n_mels = 0
    if has_cond:
        n_mels = conditioner.shape[1]
        in_specs.append(pl.BlockSpec((1, n_mels, Tt), lambda b, i: (b, 0, i)))
        operands.append(conditioner.astype(bf16))
    in_specs += [
        pl.BlockSpec((C2, K), lambda b, i: (0, 0)),                     # fused z-stage weight
        pl.BlockSpec((C2, C), lambda b, i: (0, 0)),                     # output projection weight
        pl.BlockSpec((C2, 1), lambda b, i: (0, 0)),                     # fused conv[+cond] bias
        pl.BlockSpec((C2, 1), lambda b, i: (0, 0)),                     # output bias
    ]
    operands += [wbig, wout, bz, bo]

    res, skip = pl.pallas_call(
        kernel,
        out_shape=(jax.ShapeDtypeStruct((B, C, T), f32),
                   jax.ShapeDtypeStruct((B, C, T), f32)),
        grid=(B, nt),
        in_specs=in_specs,
        out_specs=(pl.BlockSpec((1, C, Tt), lambda b, i: (b, 0, i)),
                   pl.BlockSpec((1, C, Tt), lambda b, i: (b, 0, i))),
        compiler_params=pltpu.CompilerParams(
            dimension_semantics=("parallel", "parallel"),
            vmem_limit_bytes=_vmem_limit_bytes(C, n_mels, Tt, d, nt, has_cond)),
    )(*operands)
    return res, skip


def _ref_forward(x, diffusion_step, conditioner, params, dilation):
    """Pure-JAX f32 reference with PyTorch ResidualBlock semantics."""
    has_cond = conditioner is not None
    if has_cond:
        Wd, bd, Wconv, bconv, Wcond, bcond, Wout, bout = params
    else:
        Wd, bd, Wconv, bconv, Wout, bout = params
    B, C, T = x.shape
    hi = jax.lax.Precision.HIGHEST
    dproj = diffusion_step @ Wd.T + bd                       # Linear(512, C)
    y = x + dproj[:, :, None]
    z = jax.lax.conv_general_dilated(                        # Conv1d(C, 2C, 3, pad=dil, dil=dil)
        y, Wconv, window_strides=(1,), padding=[(dilation, dilation)],
        rhs_dilation=(dilation,), dimension_numbers=("NCH", "OIH", "NCH"),
        precision=hi) + bconv[None, :, None]
    if has_cond:
        z = z + jnp.einsum("omx,bmt->bot", Wcond, conditioner, precision=hi) \
              + bcond[None, :, None]                         # Conv1d(n_mels, 2C, 1)
    gate, filt = z[:, :C], z[:, C:]
    g = jax.nn.sigmoid(gate) * jnp.tanh(filt)
    out = jnp.einsum("ocx,bct->bot", Wout, g, precision=hi) + bout[None, :, None]
    return (x + out[:, :C]) / math.sqrt(2.0), out[:, C:]


if __name__ == "__main__":
    key = jax.random.PRNGKey(0)
    ks = jax.random.split(key, 11)

    # Small DiffWave-like shapes: batch=2, residual_channels=64, n_mels=80,
    # T=512 frames, dilation=4; diffusion embedding dim 512 is fixed by the
    # module's Linear(512, C).  time_tile=256 -> 2 time tiles per batch, which
    # exercises the cross-tile halo and the zero-padded sequence edges
    # (production uses the larger default tiles).
    B, C, n_mels, T, dilation = 2, 64, 80, 512, 4

    def rnd(k, shape, scale):
        return scale * jax.random.normal(k, shape, jnp.float32)

    x = rnd(ks[0], (B, C, T), 1.0)
    diffusion_step = rnd(ks[1], (B, 512), 1.0)
    conditioner = rnd(ks[2], (B, n_mels, T), 1.0)

    params = (
        rnd(ks[3], (C, 512), 1.0 / math.sqrt(512.0)),            # diffusion_projection.weight
        rnd(ks[4], (C,), 0.3),                                   # diffusion_projection.bias
        rnd(ks[5], (2 * C, C, 3), math.sqrt(2.0 / (3 * C))),     # dilated_conv.weight (kaiming)
        rnd(ks[6], (2 * C,), 0.3),                               # dilated_conv.bias
        rnd(ks[7], (2 * C, n_mels, 1), math.sqrt(2.0 / n_mels)),  # conditioner_projection.weight
        rnd(ks[8], (2 * C,), 0.3),                               # conditioner_projection.bias
        rnd(ks[9], (2 * C, C, 1), math.sqrt(2.0 / C)),           # output_projection.weight
        rnd(ks[10], (2 * C,), 0.3),                              # output_projection.bias
    )

    # Tolerances cover bf16 streaming of activations/weights (intentional
    # precision/bandwidth tradeoff) vs the HIGHEST-precision f32 reference.
    ATOL, RTOL, MEAN_TOL = 1e-1, 5e-2, 2e-2

    # --- conditional branch (the DiffWave path) ---
    fwd = jax.jit(functools.partial(residual_block_forward,
                                    dilation=dilation, time_tile=256))
    res, skip = fwd(x, diffusion_step, conditioner, params)
    jax.block_until_ready((res, skip))
    assert res.shape == (B, C, T) and skip.shape == (B, C, T)

    res_ref, skip_ref = _ref_forward(x, diffusion_step, conditioner, params, dilation)
    max_err = max(float(jnp.max(jnp.abs(res - res_ref))),
                  float(jnp.max(jnp.abs(skip - skip_ref))))
    mean_err = max(float(jnp.mean(jnp.abs(res - res_ref))),
                   float(jnp.mean(jnp.abs(skip - skip_ref))))
    assert jnp.allclose(res, res_ref, atol=ATOL, rtol=RTOL), (max_err, mean_err)
    assert jnp.allclose(skip, skip_ref, atol=ATOL, rtol=RTOL), (max_err, mean_err)
    assert mean_err < MEAN_TOL, mean_err

    # --- unconditional branch (conditioner_projection is None) ---
    params_uncond = params[:4] + params[6:]
    fwd_u = jax.jit(functools.partial(residual_block_forward,
                                      dilation=dilation, time_tile=256))
    res_u, skip_u = fwd_u(x, diffusion_step, None, params_uncond)
    jax.block_until_ready((res_u, skip_u))
    res_ur, skip_ur = _ref_forward(x, diffusion_step, None, params_uncond, dilation)
    assert jnp.allclose(res_u, res_ur, atol=ATOL, rtol=RTOL)
    assert jnp.allclose(skip_u, skip_ur, atol=ATOL, rtol=RTOL)

    print("KERNEL_OK")
</pallas_src>

<mosaic_0001>
module attributes {stable_mosaic.version = 11 : i64} {
  func.func @_residual_block_kernel(%arg0: i32, %arg1: i32, %arg2: memref<1x64x256xbf16, #tpu.memory_space<vmem>>, %arg3: memref<1x2x64x8xbf16, #tpu.memory_space<vmem>>, %arg4: memref<1x64x1xbf16, #tpu.memory_space<vmem>>, %arg5: memref<1x80x256xbf16, #tpu.memory_space<vmem>>, %arg6: memref<128x272xbf16, #tpu.memory_space<vmem>>, %arg7: memref<128x64xbf16, #tpu.memory_space<vmem>>, %arg8: memref<128x1xf32, #tpu.memory_space<vmem>>, %arg9: memref<128x1xf32, #tpu.memory_space<vmem>>, %arg10: memref<1x64x256xf32, #tpu.memory_space<vmem>>, %arg11: memref<1x64x256xf32, #tpu.memory_space<vmem>>) attributes {dimension_semantics = [#tpu.dimension_semantics<parallel>, #tpu.dimension_semantics<parallel>], iteration_bounds = array<i64: 2, 2>, scalar_prefetch = 0 : i64, scratch_operands = 0 : i64, tpu.core_type = #tpu.core_type<tc>, window_params = [{transform_indices = @transform_0, window_bounds = array<i64: 1, 64, 256>}, {transform_indices = @transform_1, window_bounds = array<i64: 1, 2, 64, 8>}, {transform_indices = @transform_2, window_bounds = array<i64: 1, 64, 1>}, {transform_indices = @transform_3, window_bounds = array<i64: 1, 80, 256>}, {pipeline_mode = #tpu.pipeline_mode<synchronous>, transform_indices = @transform_4, window_bounds = array<i64: 128, 272>}, {pipeline_mode = #tpu.pipeline_mode<synchronous>, transform_indices = @transform_5, window_bounds = array<i64: 128, 64>}, {pipeline_mode = #tpu.pipeline_mode<synchronous>, transform_indices = @transform_6, window_bounds = array<i64: 128, 1>}, {pipeline_mode = #tpu.pipeline_mode<synchronous>, transform_indices = @transform_7, window_bounds = array<i64: 128, 1>}, {transform_indices = @transform_8, window_bounds = array<i64: 1, 64, 256>}, {transform_indices = @transform_9, window_bounds = array<i64: 1, 64, 256>}]} {
    %c0 = arith.constant 0 : index
    %c0_0 = arith.constant 0 : index
    %c0_1 = arith.constant 0 : index
    %0 = vector.load %arg2[%c0, %c0_0, %c0_1] : memref<1x64x256xbf16, #tpu.memory_space<vmem>>, vector<1x64x256xbf16>
    %1 = vector.shape_cast %0 : vector<1x64x256xbf16> to vector<64x256xbf16>
    %c0_2 = arith.constant 0 : index
    %c0_3 = arith.constant 0 : index
    %c0_4 = arith.constant 0 : index
    %2 = vector.load %arg4[%c0_2, %c0_3, %c0_4] : memref<1x64x1xbf16, #tpu.memory_space<vmem>>, vector<1x64x1xbf16>
    %3 = vector.shape_cast %2 : vector<1x64x1xbf16> to vector<64x1xbf16>
    %4 = vector.broadcast %3 : vector<64x1xbf16> to vector<64x256xbf16>
    %5 = arith.addf %1, %4 : vector<64x256xbf16>
    %c0_5 = arith.constant 0 : index
    %6 = arith.index_cast %arg1 : i32 to index
    %c0_6 = arith.constant 0 : index
    %c0_7 = arith.constant 0 : index
    %7 = vector.load %arg3[%c0_5, %6, %c0_6, %c0_7] : memref<1x2x64x8xbf16, #tpu.memory_space<vmem>>, vector<1x1x64x8xbf16>
    %8 = vector.shape_cast %7 : vector<1x1x64x8xbf16> to vector<64x8xbf16>
    %9 = vector.extract_strided_slice %8 {offsets = [0, 0], sizes = [64, 4], strides = [1, 1]} : vector<64x8xbf16> to vector<64x4xbf16>
    %10 = vector.extract_strided_slice %5 {offsets = [0, 0], sizes = [64, 252], strides = [1, 1]} : vector<64x256xbf16> to vector<64x252xbf16>
    %11 = tpu.concatenate %9, %10 in 1 : vector<64x4xbf16>, vector<64x252xbf16> -> vector<64x256xbf16>
    %12 = vector.extract_strided_slice %5 {offsets = [0, 4], sizes = [64, 252], strides = [1, 1]} : vector<64x256xbf16> to vector<64x252xbf16>
    %13 = vector.extract_strided_slice %8 {offsets = [0, 4], sizes = [64, 4], strides = [1, 1]} : vector<64x8xbf16> to vector<64x4xbf16>
    %14 = tpu.concatenate %12, %13 in 1 : vector<64x252xbf16>, vector<64x4xbf16> -> vector<64x256xbf16>
    %c0_8 = arith.constant 0 : index
    %c0_9 = arith.constant 0 : index
    %c0_10 = arith.constant 0 : index
    %15 = vector.load %arg5[%c0_8, %c0_9, %c0_10] : memref<1x80x256xbf16, #tpu.memory_space<vmem>>, vector<1x80x256xbf16>
    %16 = vector.shape_cast %15 : vector<1x80x256xbf16> to vector<80x256xbf16>
    %17 = tpu.concatenate %11, %5, %14, %16 in 0 : vector<64x256xbf16>, vector<64x256xbf16>, vector<64x256xbf16>, vector<80x256xbf16> -> vector<272x256xbf16>
    %c0_11 = arith.constant 0 : index
    %c0_12 = arith.constant 0 : index
    %18 = vector.load %arg6[%c0_11, %c0_12] : memref<128x272xbf16, #tpu.memory_space<vmem>>, vector<128x272xbf16>
    %cst = arith.constant dense<0.000000e+00> : vector<128x256xf32>
    %19 = tpu.matmul %18, %17, %cst {dimension_numbers = #tpu.dot_dimension_numbers<[1], [0], [0], [1], [0, 0, 1, 1], [], []>} : vector<128x272xbf16>, vector<272x256xbf16>, vector<128x256xf32> -> vector<128x256xf32>
    %c0_13 = arith.constant 0 : index
    %c0_14 = arith.constant 0 : index
    %20 = vector.load %arg8[%c0_13, %c0_14] : memref<128x1xf32, #tpu.memory_space<vmem>>, vector<128x1xf32>
    %21 = vector.broadcast %20 : vector<128x1xf32> to vector<128x256xf32>
    %22 = arith.addf %19, %21 : vector<128x256xf32>
    %23 = vector.extract_strided_slice %22 {offsets = [0, 0], sizes = [64, 256], strides = [1, 1]} : vector<128x256xf32> to vector<64x256xf32>
    %24 = vector.extract_strided_slice %22 {offsets = [64, 0], sizes = [64, 256], strides = [1, 1]} : vector<128x256xf32> to vector<64x256xf32>
    %cst_15 = arith.constant 5.000000e-01 : f32
    %25 = vector.broadcast %cst_15 : f32 to vector<64x256xf32>
    %26 = arith.mulf %25, %23 : vector<64x256xf32>
    %27 = math.tanh %26 : vector<64x256xf32>
    %cst_16 = arith.constant 5.000000e-01 : f32
    %28 = vector.broadcast %cst_16 : f32 to vector<64x256xf32>
    %29 = arith.mulf %28, %27 : vector<64x256xf32>
    %cst_17 = arith.constant 5.000000e-01 : f32
    %30 = vector.broadcast %cst_17 : f32 to vector<64x256xf32>
    %31 = arith.addf %29, %30 : vector<64x256xf32>
    %32 = math.tanh %24 : vector<64x256xf32>
    %33 = arith.mulf %31, %32 : vector<64x256xf32>
    %c0_18 = arith.constant 0 : index
    %c0_19 = arith.constant 0 : index
    %34 = vector.load %arg7[%c0_18, %c0_19] : memref<128x64xbf16, #tpu.memory_space<vmem>>, vector<128x64xbf16>
    %35 = arith.truncf %33 : vector<64x256xf32> to vector<64x256xbf16>
    %cst_20 = arith.constant dense<0.000000e+00> : vector<128x256xf32>
    %36 = tpu.matmul %34, %35, %cst_20 {dimension_numbers = #tpu.dot_dimension_numbers<[1], [0], [0], [1], [0, 0, 1, 1], [], []>} : vector<128x64xbf16>, vector<64x256xbf16>, vector<128x256xf32> -> vector<128x256xf32>
    %c0_21 = arith.constant 0 : index
    %c0_22 = arith.constant 0 : index
    %37 = vector.load %arg9[%c0_21, %c0_22] : memref<128x1xf32, #tpu.memory_space<vmem>>, vector<128x1xf32>
    %38 = vector.broadcast %37 : vector<128x1xf32> to vector<128x256xf32>
    %39 = arith.addf %36, %38 : vector<128x256xf32>
    %40 = vector.extract_strided_slice %39 {offsets = [0, 0], sizes = [64, 256], strides = [1, 1]} : vector<128x256xf32> to vector<64x256xf32>
    %41 = arith.extf %1 : vector<64x256xbf16> to vector<64x256xf32>
    %42 = arith.addf %41, %40 : vector<64x256xf32>
    %cst_23 = arith.constant 0.707106769 : f32
    %43 = vector.broadcast %cst_23 : f32 to vector<64x256xf32>
    %44 = arith.mulf %42, %43 : vector<64x256xf32>
    %c0_24 = arith.constant 0 : index
    %c0_25 = arith.constant 0 : index
    %c0_26 = arith.constant 0 : index
    %45 = vector.load %arg10[%c0_24, %c0_25, %c0_26] : memref<1x64x256xf32, #tpu.memory_space<vmem>>, vector<1x64x256xf32>
    %46 = vector.shape_cast %45 : vector<1x64x256xf32> to vector<64x256xf32>
    %47 = vector.shape_cast %44 : vector<64x256xf32> to vector<1x64x256xf32>
    tpu.vector_store %arg10[%c0_24, %c0_25, %c0_26], %47 {strides = array<i32>} : memref<1x64x256xf32, #tpu.memory_space<vmem>>, vector<1x64x256xf32>,
    %48 = vector.extract_strided_slice %39 {offsets = [64, 0], sizes = [64, 256], strides = [1, 1]} : vector<128x256xf32> to vector<64x256xf32>
    %c0_27 = arith.constant 0 : index
    %c0_28 = arith.constant 0 : index
    %c0_29 = arith.constant 0 : index
    %49 = vector.load %arg11[%c0_27, %c0_28, %c0_29] : memref<1x64x256xf32, #tpu.memory_space<vmem>>, vector<1x64x256xf32>
    %50 = vector.shape_cast %49 : vector<1x64x256xf32> to vector<64x256xf32>
    %51 = vector.shape_cast %48 : vector<64x256xf32> to vector<1x64x256xf32>
    tpu.vector_store %arg11[%c0_27, %c0_28, %c0_29], %51 {strides = array<i32>} : memref<1x64x256xf32, #tpu.memory_space<vmem>>, vector<1x64x256xf32>,
    return
  }
  func.func @transform_0(%arg0: i32, %arg1: i32) -> (i32, i32, i32) {
    %c0_i32 = arith.constant 0 : i32
    %c0_i32_0 = arith.constant 0 : i32
    return %arg0, %c0_i32, %arg1 : i32, i32, i32
  }
  func.func @transform_1(%arg0: i32, %arg1: i32) -> (i32, i32, i32, i32) {
    %c0_i32 = arith.constant 0 : i32
    %c0_i32_0 = arith.constant 0 : i32
    %c0_i32_1 = arith.constant 0 : i32
    %c0_i32_2 = arith.constant 0 : i32
    return %arg0, %c0_i32, %c0_i32_0, %c0_i32_1 : i32, i32, i32, i32
  }
  func.func @transform_2(%arg0: i32, %arg1: i32) -> (i32, i32, i32) {
    %c0_i32 = arith.constant 0 : i32
    %c0_i32_0 = arith.constant 0 : i32
    %c0_i32_1 = arith.constant 0 : i32
    return %arg0, %c0_i32, %c0_i32_0 : i32, i32, i32
  }
  func.func @transform_3(%arg0: i32, %arg1: i32) -> (i32, i32, i32) {
    %c0_i32 = arith.constant 0 : i32
    %c0_i32_0 = arith.constant 0 : i32
    return %arg0, %c0_i32, %arg1 : i32, i32, i32
  }
  func.func @transform_4(%arg0: i32, %arg1: i32) -> (i32, i32) {
    %c0_i32 = arith.constant 0 : i32
    %c0_i32_0 = arith.constant 0 : i32
    %c0_i32_1 = arith.constant 0 : i32
    return %c0_i32, %c0_i32_0 : i32, i32
  }
  func.func @transform_5(%arg0: i32, %arg1: i32) -> (i32, i32) {
    %c0_i32 = arith.constant 0 : i32
    %c0_i32_0 = arith.constant 0 : i32
    %c0_i32_1 = arith.constant 0 : i32
    return %c0_i32, %c0_i32_0 : i32, i32
  }
  func.func @transform_6(%arg0: i32, %arg1: i32) -> (i32, i32) {
    %c0_i32 = arith.constant 0 : i32
    %c0_i32_0 = arith.constant 0 : i32
    %c0_i32_1 = arith.constant 0 : i32
    return %c0_i32, %c0_i32_0 : i32, i32
  }
  func.func @transform_7(%arg0: i32, %arg1: i32) -> (i32, i32) {
    %c0_i32 = arith.constant 0 : i32
    %c0_i32_0 = arith.constant 0 : i32
    %c0_i32_1 = arith.constant 0 : i32
    return %c0_i32, %c0_i32_0 : i32, i32
  }
  func.func @transform_8(%arg0: i32, %arg1: i32) -> (i32, i32, i32) {
    %c0_i32 = arith.constant 0 : i32
    %c0_i32_0 = arith.constant 0 : i32
    return %arg0, %c0_i32, %arg1 : i32, i32, i32
  }
  func.func @transform_9(%arg0: i32, %arg1: i32) -> (i32, i32, i32) {
    %c0_i32 = arith.constant 0 : i32
    %c0_i32_0 = arith.constant 0 : i32
    return %arg0, %c0_i32, %arg1 : i32, i32, i32
  }
}

</mosaic_0001>

<bundles_post_ra>
// kernel: residual_block_forward.1
= control target key start
LH: loop header
LB: loop body
LE: loop exit
PB: predicated region body
PF: predicated region fallthrough
CT: control target
= control target key end

     0   :  { %s3344_s0 = inlined_call_operand.vmem [shape: bf16[2,64,512], index: 0, kind: input, shape index: {}]   ;;  %s3345_s1 = inlined_call_operand.vmem [shape: bf16[2,2,64,8], index: 1, kind: input, shape index: {}]   ;;  %s3346_s2 = inlined_call_operand.vmem [shape: bf16[2,64,1], index: 2, kind: input, shape index: {}]   ;;  %s3347_s3 = inlined_call_operand.vmem [shape: bf16[2,80,512], index: 3, kind: input, shape index: {}]   ;;  %s3348_s4 = inlined_call_operand.vmem [shape: bf16[128,272], index: 4, kind: input, shape index: {}]   ;;  %s3349_s5 = inlined_call_operand.vmem [shape: bf16[128,64], index: 5, kind: input, shape index: {}]   ;;  %s3350_s6 = inlined_call_operand.vmem [shape: f32[128,1], index: 6, kind: input, shape index: {}]   ;;  %s3351_s7 = inlined_call_operand.vmem [shape: f32[128,1], index: 7, kind: input, shape index: {}]   ;;  %s3352_s8 = inlined_call_operand.hbm [shape: f32[2,64,512], index: 8, kind: output, shape index: {0}]   ;;  %s3353_s9 = inlined_call_operand.hbm [shape: f32[2,64,512], index: 9, kind: output, shape index: {1}]  }
   0x1   :  { %3357 = sst [smem:[#allocation13_spill]] %s3344_s0 }
   0x2   :  { %3358 = sst [smem:[#allocation14_spill]] %s3345_s1 }
   0x3   :  { %15 = vsyncpa [#allocation5], 0 }
   0x4   :  { %17 = vsyncpa [#allocation5 + $0x1], 0 }
   0x5   :  { %18 = vsyncpa [#allocation7], 0 }
   0x6   :  { %20 = vsyncpa [#allocation7 + $0x1], 0  ;;  %s2662_s30 = smov 0   ;;  %s2664_s10 = smov 0  }
   0x7   :  { %s2666_s11 = smov 0   ;;  %s2668_s12 = smov 0  }
   0x8   :  { %s2670_s13 = smov 0   ;;  %s2672_s14 = smov 0  }
   0x9   :  { %s2674_s15 = smov 0   ;;  %s2676_s16 = smov 0  }
   0xa LB: > { %s2087_s17 = sadd.s32 4294967295, %s2600_s16   ;;  %s2088_s18 = sadd.s32 4294967294, %s2600_s16   ;;  %s2600_s16 = sphi %s2676_s16, %s26_s16   ;;  %s2596_s15 = sphi %s2674_s15, %s3376_s15   ;;  %s2592_s14 = sphi %s2672_s14, %s3375_s14   ;;  %s2588_s13 = sphi %s2670_s13, %s3374_s13   ;;  %s2584_s12 = sphi %s2668_s12, %s3373_s12   ;;  %s2580_s11 = sphi %s2666_s11, %s3372_s11   ;;  %s2576_s10 = sphi %s2664_s10, %s3371_s10   ;;  %s2572_s30 = sphi %s2662_s30, %s3370_s30  }
   0xb   : > { %s35_s19 = sadd.s32 1, %s2592_s14  ;;  %s38_s20 = sadd.s32 1, %s2596_s15 }
   0xc   : > { %p36_p0 = scmp.ge.s32.totalorder %s35_s19, 2  ;;  %p54_p1 = scmp.ne.s32.totalorder %s2580_s11, %s2576_s10 }
   0xd   : > { %p55_p2 = scmp.eq.s32.totalorder %s2600_s16, 0  ;;  %p250_p5 = scmp.eq.s32.totalorder %s2087_s17, 3 }
   0xe   : > { %s3378_s19 = smov (%p36_p0, %s35_s19), 0  ;;  %s3380_s20 = smov (!%p36_p0, %s38_s20), %s2596_s15 }
   0xf   : > { %3359 = sst [smem:[#allocation10_spill]] %s3378_s19  ;;  %s43_s21 = ssub.s32 %s2592_s14, %s3378_s19 }
  0x10   : > { %p2714_p3 = por %p55_p2, %p54_p1  ;;  %p40_p4 = scmp.ge.s32.totalorder %s3380_s20, 2 }
  0x11   : > { %p255_p6 = scmp.ne.s32.totalorder %s2576_s10, %s2572_s30  ;;  %p256_p7 = scmp.eq.s32.totalorder %s2088_s18, 3 }
  0x12   : > { %s3382_s20 = smov (%p40_p4, %s3380_s20), 0  ;;  %p2722_p8 = por %p250_p5, %p54_p1 }
  0x13   : > { %3361 = sst [smem:[#allocation11_spill]] %s3382_s20  ;;  %p2726_p9 = por %p256_p7, %p255_p6 }
  0x14   : > { %s42_s25 = ssub.s32 %s2596_s15, %s3382_s20  ;;  %s47_s27 = sadd.s32 1, %s2580_s11 }
  0x15   : > { %s3363_s24 = scalar_select %p2726_p9, 1, 0 }
  0x16   : > { %s44_s26 = sor.u32 %s43_s21, %s42_s25  ;;  %p2090_p11 = scmp.ge.s32.totalorder %s2600_s16, 4 }
  0x17   : > { %3364 = sst [smem:[#allocation12_spill]] %s3363_s24  ;;  %p45_p10 = scmp.eq.s32.totalorder %s44_s26, 0 }
  0x18   : > { %312 = sbr.rel (%p2090_p11) target bundleno = 58 (0x3a), region = 32 }
  0x19   : > { %s2734_s28 = scalar_select %p45_p10, %s2580_s11, %s47_s27  }
  0x1f   : > { %315 = sbr.rel (!%p2714_p3) target bundleno = 45 (0x2d), region = 36  ;;  %s317_s29 = sand.u32 (%p2714_p3), 1, %s2580_s11  }
  0x20   : > { %s2092_s17 = sshll.u32 (%p2714_p3), %s2592_s14, 1  ;;  %s2091_s18 = sshll.u32 (%p2714_p3), %s317_s29, 6 }
  0x21   : > { %s2093_s19 = sshll.u32 (%p2714_p3), %s2596_s15, 5  ;;  %s3365_s0 = sld [smem:[#allocation13_spill]] (%p2714_p3) }
  0x22   : > { %s322_s24 = sadd.s32 (%p2714_p3), %s2093_s19, %s2092_s17  ;;  %s319_s27 = scalar_lea.vmem (%p2714_p3), [#allocation2], %s2091_s18 }
  0x23   : > { %s2094_s20 = sshll.u32 (%p2714_p3), %s322_s24, 2 }
  0x27   : > { %s324_s26 = scalar_lea.vmem %s3365_s0, %s2094_s20 }
  0x28   : > { %v366_v0 = vld [vmem:[%s324_s26] sm:$0xff]  ;;  %v368_v1 = vld [vmem:[%s324_s26 + $0x10] sm:$0xff] }
  0x29   : > { %v370_v2 = vld [vmem:[%s324_s26 + $0x20] sm:$0xff]  ;;  %367 = vst [vmem:[%s319_s27] sm:$0xff] %v366_v0  ;;  %369 = vst [vmem:[%s319_s27 + $0x8] sm:$0xff] %v368_v1  ;;  %v372_v3 = vld [vmem:[%s324_s26 + $0x30] sm:$0xff] }
  0x2a   : > { %371 = vst [vmem:[%s319_s27 + $0x10] sm:$0xff] %v370_v2  ;;  %v374_v4 = vld [vmem:[%s324_s26 + $0x40] sm:$0xff]  ;;  %v376_v5 = vld [vmem:[%s324_s26 + $0x50] sm:$0xff]  ;;  %373 = vst [vmem:[%s319_s27 + $0x18] sm:$0xff] %v372_v3 }
  0x2b   : > { %375 = vst [vmem:[%s319_s27 + $0x20] sm:$0xff] %v374_v4  ;;  %377 = vst [vmem:[%s319_s27 + $0x28] sm:$0xff] %v376_v5  ;;  %v378_v6 = vld [vmem:[%s324_s26 + $0x60] sm:$0xff]  ;;  %v380_v7 = vld [vmem:[%s324_s26 + $0x70] sm:$0xff] }
  0x2c   : > { %379 = vst [vmem:[%s319_s27 + $0x30] sm:$0xff] %v378_v6  ;;  %381 = vst [vmem:[%s319_s27 + $0x38] sm:$0xff] %v380_v7 }
  0x2d PF: > { %403 = sbr.rel (!%p2714_p3) target bundleno = 58 (0x3a), region = 82  ;;  %s405_s19 = sand.u32 (%p2714_p3), 1, %s2580_s11  }
  0x2e   : > { %s2254_s20 = smul.u32 (%p2714_p3), 80, %s405_s19  ;;  %s2095_s24 = sshll.u32 (%p2714_p3), %s2592_s14, 1 }
  0x2f   : > { %s2255_s29 = smul.u32 (%p2714_p3), 40, %s2596_s15 }
  0x30   : > { %s407_s26 = scalar_lea.vmem (%p2714_p3), [#allocation3], %s2254_s20 }
  0x31   : > { %s410_s17 = sadd.s32 (%p2714_p3), %s2255_s29, %s2095_s24 }
  0x32   : > { %s2096_s18 = sshll.u32 (%p2714_p3), %s410_s17, 2 }
  0x33   : > { %s412_s0 = scalar_lea.vmem (%p2714_p3), %s3347_s3, %s2096_s18 }
  0x34   : > { %v458_v8 = vld [vmem:[%s412_s0] sm:$0xff]  ;;  %v460_v9 = vld [vmem:[%s412_s0 + $0x10] sm:$0xff] }
  0x35   : > { %v462_v10 = vld [vmem:[%s412_s0 + $0x20] sm:$0xff]  ;;  %459 = vst [vmem:[%s407_s26] sm:$0xff] %v458_v8  ;;  %461 = vst [vmem:[%s407_s26 + $0x8] sm:$0xff] %v460_v9  ;;  %v464_v11 = vld [vmem:[%s412_s0 + $0x30] sm:$0xff] }
  0x36   : > { %463 = vst [vmem:[%s407_s26 + $0x10] sm:$0xff] %v462_v10  ;;  %v466_v12 = vld [vmem:[%s412_s0 + $0x40] sm:$0xff]  ;;  %v468_v13 = vld [vmem:[%s412_s0 + $0x50] sm:$0xff]  ;;  %465 = vst [vmem:[%s407_s26 + $0x18] sm:$0xff] %v464_v11 }
  0x37   : > { %467 = vst [vmem:[%s407_s26 + $0x20] sm:$0xff] %v466_v12  ;;  %469 = vst [vmem:[%s407_s26 + $0x28] sm:$0xff] %v468_v13  ;;  %v470_v14 = vld [vmem:[%s412_s0 + $0x60] sm:$0xff]  ;;  %v472_v15 = vld [vmem:[%s412_s0 + $0x70] sm:$0xff] }
  0x38   : > { %v474_v16 = vld [vmem:[%s412_s0 + $0x80] sm:$0xff]  ;;  %471 = vst [vmem:[%s407_s26 + $0x30] sm:$0xff] %v470_v14  ;;  %473 = vst [vmem:[%s407_s26 + $0x38] sm:$0xff] %v472_v15  ;;  %v476_v17 = vld [vmem:[%s412_s0 + $0x90] sm:$0xff] }
  0x39   : > { %475 = vst [vmem:[%s407_s26 + $0x40] sm:$0xff] %v474_v16  ;;  %477 = vst [vmem:[%s407_s26 + $0x48] sm:$0xff] %v476_v17 }
  0x3a PF: > { %p2097_p12 = scmp.ge.s32.totalorder %s2600_s16, 1  ;;  %p482_p13 = scmp.lt.s32.totalorder %s2600_s16, 5 }
  0x3c   : > { %p483_p0 = pnand %p2097_p12, %p482_p13 }
  0x3d   : > { %p551_p1 = scmp.lt.s32.totalorder (!%p483_p0), %s2588_s13, 1  ;;  %v2602_v18 = vmov (!%p483_p0), 0   ;;  %s3366_s1 = sld [smem:[#allocation14_spill]] (!%p483_p0)  ;;  %v2603_v27 = vmov (!%p483_p0), 839922192   ;;  %v589_v29 = vlaneseq (!%p483_p0)  ;;  %v941_v13 = vld [vmem:[%s3350_s6 + $0x8] sm:$0xff] (!%p483_p0) }
  0x3e   : > { %486 = sbr.rel (%p483_p0) target bundleno = 978 (0x3d2), region = 120  ;;  %2342 = vset.pattern.permute.xlu1 (!%p483_p0), %v2602_v18  ;;  %2341 = vset.pattern.permute.xlu0 (!%p483_p0), %v2602_v18  ;;  %s2189_s21 = sshll.u32 (!%p483_p0), %s2584_s12, 5  ;;  %v587_v28 = vunpack.c.l.s4 (!%p483_p0), %v2603_v27  ;;  %v940_v14 = vld [vmem:[%s3350_s6] sm:$0xff] (!%p483_p0)  ;;  %v943_v15 = vld [vmem:[%s3350_s6 + $0x18] sm:$0xff] (!%p483_p0)  ;;  %v942_v16 = vld [vmem:[%s3350_s6 + $0x10] sm:$0xff] (!%p483_p0)  ;;  %vm1156_vm0 = vcmask (!%p483_p0), 130048  }
  0x3f   : > { %1326 = vmatprep.mubr.bf16.mxu1 (!%p483_p0), %v2602_v18  ;;  %v590_v31 = vshrl.u32 (!%p483_p0), %v589_v29, 7  ;;  %s2770_s26 = sand.u32 (!%p483_p0), 1, %s2576_s10   ;;  %s2604_s27 = smov (!%p483_p0), 4   ;;  %v949_v17 = vld [vmem:[%s3350_s6 + $0x48] sm:$0xff] (!%p483_p0)  ;;  %v950_v27 = vld [vmem:[%s3350_s6 + $0x50] sm:$0xff] (!%p483_p0)  ;;  %vm764_vm1 = vcmask (!%p483_p0), 31744  }
  0x40   : > { %v588_v30 = vunpack.c.0.s8 (!%p483_p0), %v587_v28  ;;  %s2605_s19 = smov (!%p483_p0), 120   ;;  %v947_v28 = vld [vmem:[%s3350_s6 + $0x38] sm:$0xff] (!%p483_p0)  ;;  %v946_v29 = vld [vmem:[%s3350_s6 + $0x30] sm:$0xff] (!%p483_p0)  ;;  %vm806_vm2 = vcmask (!%p483_p0), 1014784   ;;  %vm1663_vm3 = vcmask (!%p483_p0), 523264   ;;  %s2179_s29 = sshll.u32 (!%p483_p0), %s2584_s12, 1 }
  0x41   : > { %s2180_s17 = sshll.u32 (!%p483_p0), %s2588_s13, 5 }
  0x42   : > { %v591_v32 = vsub.s32 (!%p483_p0), %v588_v30, %v590_v31  ;;  %v2366_v30 = vld [vmem:[%s3348_s4 + $0x20] ss:$12 sps:$4 sm:$0xff] (!%p483_p0)  }
  0x43   : > { %v953_v31 = vld [vmem:[%s3350_s6 + $0x68] sm:$0xff] (!%p483_p0) }
  0x45   : > { %s552_s22 = scalar_select %p551_p1, %s2588_s13, 1 }
  0x47   : > { %s2188_s0 = sshll.u32 %s552_s22, 5  ;;  %s2187_s24 = sshll.u32 %s552_s22, 6 }
  0x48   : > { %s560_s20 = scalar_lea.vmem %s3346_s2, %s2188_s0  ;;  %s555_s18 = scalar_lea.vmem %s3366_s1, %s2187_s24 }
  0x49   : > { %v575_v19 = vld [vmem:[%s560_s20 + $0x8] sm:$0xf]  ;;  %v573_v20 = vld [vmem:[%s560_s20] sm:$0xf]  ;;  %v576_v21 = vld [vmem:[%s560_s20 + $0xc] sm:$0xf]  ;;  %s2767_s25 = scalar_lea.vmem %s555_s18, %s2189_s21  ;;  %s3212_s1 = sadd.s32 %s2180_s17, %s2179_s29 }
  0x4a   : > { %607 = vperm.xlu1 %2342, %v575_v19   ;;  %583 = vperm.xlu0 %2341, %v573_v20   ;;  %v574_v22 = vld [vmem:[%s560_s20 + $0x4] sm:$0xf]  ;;  %v578_v23 = vld [vmem:[%s560_s20 + $0x14] sm:$0xf]  ;;  %v577_v24 = vld [vmem:[%s560_s20 + $0x10] sm:$0xf] }
  0x4b   : > { %v580_v25 = vld [vmem:[%s560_s20 + $0x1c] sm:$0xf]  ;;  %v579_v26 = vld [vmem:[%s560_s20 + $0x18] sm:$0xf]  ;;  %s2098_s0 = sshll.u32 %s2770_s26, 6  ;;  %v2808_v9 = vld [vmem:[%s2767_s25] sm:$0xff]  }
  0x4c   : > { %s2773_s22 = scalar_lea.vmem [#allocation2], %s2098_s0  ;;  %v2811_v10 = vld [vmem:[%s2767_s25 + $0x8] sm:$0xff]   ;;  %v2816_v11 = vld [vmem:[%s2767_s25 + $0x10] sm:$0xff]   ;;  %s2606_s20 = smov 124   ;;  %v2827_v12 = vld [vmem:[%s2767_s25 + $0x18] sm:$0xff]  }
  0x4d   : > { %v565_v37 = vld [vmem:[%s2773_s22] sm:$0xff]  ;;  %v566_v40 = vld [vmem:[%s2773_s22 + $0x8] sm:$0xff]  ;;  %v567_v41 = vld [vmem:[%s2773_s22 + $0x10] sm:$0xff]  ;;  %s2256_s24 = smul.u32 80, %s2770_s26  ;;  %s2099_s25 = sshll.u32 %s2770_s26, 7 }
  0x4e   : > { %619 = vperm.xlu1 %2342, %v576_v21   ;;  %595 = vperm.xlu0 %2341, %v574_v22   ;;  %v568_v42 = vld [vmem:[%s2773_s22 + $0x18] sm:$0xff]  ;;  %v570_v55 = vld [vmem:[%s2773_s22 + $0x28] sm:$0xff]  ;;  %v569_v56 = vld [vmem:[%s2773_s22 + $0x20] sm:$0xff]  ;;  %s2181_s12 = sshll.u32 %s3212_s1, 7  ;;  %s2607_s0 = smov [#allocation4]  }
  0x4f   : > { %v572_v1 = vld [vmem:[%s2773_s22 + $0x38] sm:$0xff]  ;;  %v571_v2 = vld [vmem:[%s2773_s22 + $0x30] sm:$0xff]  ;;  %s2833_s18 = scalar_lea.vmem [#allocation3], %s2256_s24  ;;  %v948_v19 = vld [vmem:[%s3350_s6 + $0x40] sm:$0xff]  ;;  %s2478_s29 = sshll.u32 %s2607_s0, 4  ;;  %s2479_s29 = int_to_ptr.vmem [resolvable:$false] %s2478_s29 }
  0x50   : > { %v2356_v20 = vld [vmem:[%s2833_s18 + $0x44] ss:$8 sps:$4 sm:$0xff]   ;;  %v2360_v21 = vld [vmem:[%s2833_s18 + $0x40] ss:$8 sps:$4 sm:$0xff]  }
  0x51   : > { %1294 = vmatprep.subr.bf16.mxu1 %v2356_v20  ;;  %v945_v22 = vld [vmem:[%s3350_s6 + $0x28] sm:$0xff] }
  0x52   : > { %643 = vperm.xlu1 %2342, %v578_v23   ;;  %631 = vperm.xlu0 %2341, %v577_v24   ;;  %v944_v23 = vld [vmem:[%s3350_s6 + $0x20] sm:$0xff] }
  0x53   : > { %1295 = vmatpush1.bf16.msra.mxu1 %v2360_v21  ;;  %v2364_v24 = vld [vmem:[%s3348_s4 + $0x4] ss:$12 sps:$4 sm:$0xff]  }
  0x54   : > { %1213 = vmatprep.mubr.bf16.mxu0 %v2364_v24 }
  0x56   : > { %667 = vperm.xlu1 %2342, %v580_v25   ;;  %655 = vperm.xlu0 %2341, %v579_v26   ;;  %v2365_v25 = vld [vmem:[%s3348_s4 + $0x8] ss:$12 sps:$4 sm:$0xff]   ;;  %v951_v26 = vld [vmem:[%s3350_s6 + $0x58] sm:$0xff] }
  0x57   : > { %2153 = vmatmul.mubr.msk.bf16.vlgmr.msra.gmra.mrb[0].mxu1 %vm1156_vm0, %v2365_v25 }
  0x58   : > { %1336 = vmatprep.mubr.bf16.mxu1 %v2602_v18 }
  0x5f   : > { %2154 = vmatmul.mubr.msk.bf16.gmra.mrb[4].mxu1 %vm1156_vm0, %v2366_v30 }
  0x60   : > { %1346 = vmatprep.mubr.bf16.mxu1 %v2602_v18 }
  0xc9   : > { %v608_v33 = vpop.permute.xlu1 %607  ;;  %v584_v34 = vpop.permute.xlu0 %583 }
  0xca   : > { %v592_v35 = vrot.slane %v584_v34, %v591_v32  ;;  %v616_v36 = vrot.slane %v608_v33, %v591_v32  ;;  %v955_v33 = vld [vmem:[%s3350_s6 + $0x78] sm:$0xff]  ;;  %v954_v34 = vld [vmem:[%s3350_s6 + $0x70] sm:$0xff] }
  0xcc   : > { %v677_v45 = vadd.bf16 %v592_v35, %v565_v37  ;;  %v679_v47 = vadd.bf16 %v616_v36, %v567_v41  ;;  %v2370_v35 = vld [vmem:[%s3348_s4 + $0x38] ss:$12 sps:$4 sm:$0xff]   ;;  %v1528_v36 = vld [vmem:[%s3351_s7 + $0x8] sm:$0xff] }
  0xcd   : > { %v620_v38 = vpop.permute.xlu1 %619  ;;  %v596_v39 = vpop.permute.xlu0 %595  ;;  %v1527_v37 = vld [vmem:[%s3351_s7] sm:$0xff]  ;;  %2155 = vmatmul.mubr.msk.bf16.gmra.mrb[8].mxu1 %vm1156_vm0, %v2370_v35  ;;  %v1532_v41 = vld [vmem:[%s3351_s7 + $0x28] sm:$0xff] }
  0xce   : > { %v628_v43 = vrot.slane %v620_v38, %v591_v32  ;;  %v604_v44 = vrot.slane %v596_v39, %v591_v32  ;;  %1356 = vmatprep.mubr.bf16.mxu1 %v2602_v18  ;;  %v1530_v38 = vld [vmem:[%s3351_s7 + $0x18] sm:$0xff]  ;;  %v1529_v39 = vld [vmem:[%s3351_s7 + $0x10] sm:$0xff] }
  0xcf   : > { %v2355_v35 = vld [vmem:[%s2833_s18 + $0x20] ss:$8 sps:$4 sm:$0xff]  }
  0xd0   : > { %v678_v46 = vadd.bf16 %v604_v44, %v566_v40  ;;  %v680_v48 = vadd.bf16 %v628_v43, %v568_v42  ;;  %v2374_v40 = vld [vmem:[%s3348_s4 + $0x50] ss:$12 sps:$4 sm:$0xff]   ;;  %v1531_v42 = vld [vmem:[%s3351_s7 + $0x20] sm:$0xff] }
  0xd1   : > { %v644_v49 = vpop.permute.xlu1 %643  ;;  %v632_v50 = vpop.permute.xlu0 %631  ;;  %v1534_v43 = vld [vmem:[%s3351_s7 + $0x38] sm:$0xff]  ;;  %v1533_v44 = vld [vmem:[%s3351_s7 + $0x30] sm:$0xff] }
  0xd2   : > { %v652_v51 = vrot.slane %v644_v49, %v591_v32  ;;  %v640_v52 = vrot.slane %v632_v50, %v591_v32  ;;  %v2779_v53 = vcombine.high %v677_v45, %v678_v46  ;;  %v2781_v54 = vcombine.low %v677_v45, %v678_v46  ;;  %v2378_v45 = vld [vmem:[%s3348_s4 + $0x68] ss:$12 sps:$4 sm:$0xff]   ;;  %v2385_v50 = vld [vmem:[%s3348_s4 + $0x80] ss:$12 sps:$4 sm:$0xff]  }
  0xd3   : > { %v2787_v59 = vcombine.high %v679_v47, %v680_v48  ;;  %v2789_v60 = vcombine.low %v679_v47, %v680_v48  ;;  %v1536_v46 = vld [vmem:[%s3351_s7 + $0x48] sm:$0xff]  ;;  %v1535_v47 = vld [vmem:[%s3351_s7 + $0x40] sm:$0xff]  ;;  %v1538_v48 = vld [vmem:[%s3351_s7 + $0x58] sm:$0xff] }
  0xd4   : > { %750 = vrot.lane.b32.xlu1 %v2779_v53, %s2604_s27  ;;  %748 = vrot.lane.b32.xlu0 %v2781_v54, %s2604_s27  ;;  %v682_v61 = vadd.bf16 %v652_v51, %v570_v55  ;;  %v681_v62 = vadd.bf16 %v640_v52, %v569_v56  ;;  %v1537_v49 = vld [vmem:[%s3351_s7 + $0x50] sm:$0xff]  ;;  %v1540_v51 = vld [vmem:[%s3351_s7 + $0x68] sm:$0xff] }
  0xd5   : > { %v668_v57 = vpop.permute.xlu1 %667  ;;  %v656_v58 = vpop.permute.xlu0 %655  ;;  %2156 = vmatmul.mubr.msk.bf16.gmra.mrb[12].mxu1 %vm1156_vm0, %v2374_v40  ;;  %v1539_v52 = vld [vmem:[%s3351_s7 + $0x60] sm:$0xff]  ;;  %v1542_v55 = vld [vmem:[%s3351_s7 + $0x78] sm:$0xff]  ;;  %v1541_v56 = vld [vmem:[%s3351_s7 + $0x70] sm:$0xff] }
  0xd6   : > { %v676_v63 = vrot.slane %v668_v57, %v591_v32  ;;  %v664_v0 = vrot.slane %v656_v58, %v591_v32  ;;  %v2795_v5 = vcombine.high %v681_v62, %v682_v61  ;;  %v2797_v6 = vcombine.low %v681_v62, %v682_v61  ;;  %v952_v32 = vld [vmem:[%s3350_s6 + $0x60] sm:$0xff]  ;;  %1366 = vmatprep.mubr.bf16.mxu1 %v2602_v18  ;;  %v2393_v58 = vld [vmem:[%s3348_s4 + $0xb0] ss:$12 sps:$4 sm:$0xff]  }
  0xd7   : > { %v2389_v57 = vld [vmem:[%s3348_s4 + $0x98] ss:$12 sps:$4 sm:$0xff]  }
  0xd8   : > { %754 = vrot.lane.b32.xlu1 %v2787_v59, %s2604_s27  ;;  %752 = vrot.lane.b32.xlu0 %v2789_v60, %s2604_s27  ;;  %v684_v3 = vadd.bf16 %v676_v63, %v572_v1  ;;  %v683_v4 = vadd.bf16 %v664_v0, %v571_v2  ;;  %v2369_v40 = vld [vmem:[%s3348_s4 + $0x18] ss:$12 sps:$4 sm:$0xff]  }
  0xda   : > { %v2801_v7 = vcombine.high %v683_v4, %v684_v3  ;;  %v2803_v8 = vcombine.low %v683_v4, %v684_v3 }
  0xdc   : > { %758 = vrot.lane.b32.xlu1 %v2795_v5, %s2604_s27  ;;  %756 = vrot.lane.b32.xlu0 %v2797_v6, %s2604_s27 }
  0xdd   : > { %2157 = vmatmul.mubr.msk.bf16.gmra.mrb[16].mxu1 %vm1156_vm0, %v2378_v45  ;;  %v2379_v45 = vld [vmem:[%s3348_s4 + $0x64] ss:$12 sps:$4 sm:$0xff]  }
  0xde   : > { %1376 = vmatprep.mubr.bf16.mxu1 %v2602_v18 }
  0xe0   : > { %762 = vrot.lane.b32.xlu1 %v2801_v7, %s2604_s27  ;;  %760 = vrot.lane.b32.xlu0 %v2803_v8, %s2604_s27  ;;  %s3193_s27 = scalar_lea.vmem [#allocation4], %s2099_s25 }
  0xe1   : > { %s1902_s13 = sshll.u32 %s3193_s27, 4  ;;  %s3227_s13 = int_to_ptr.vmem [resolvable:$true] %s1902_s13 }
  0xe2   : > { %s2474_s21 = scalar_lea.vmem %s3227_s13, 2048  ;;  %p2481_p5 = scmp.lt.s32.totalorder %s3227_s13, %s2479_s29 }
  0xe3   : > { %p2475_p2 = scmp.ne.s32.totalorder %s3227_s13, %s2474_s21 }
  0xe4   : > { %815 = vrot.lane.b32.xlu1 %v2808_v9, %s2605_s19  ;;  %817 = vrot.lane.b32.xlu0 %v2811_v10, %s2605_s19 }
  0xe5   : > { %2158 = vmatmul.mubr.msk.bf16.gmra.mrb[20].mxu1 %vm1156_vm0, %v2385_v50  ;;  %v2388_v50 = vld [vmem:[%s3348_s4 + $0x90] ss:$12 sps:$4 sm:$0xff]   ;;  %p2476_p3 = pnand %p2475_p2, %p2722_p8 }
  0xe6   : > { %1386 = vmatprep.mubr.bf16.mxu1 %v2602_v18 }
  0xe7   : > { %p2477_p4 = pneg %p2476_p3 }
  0xe8   : > { %819 = vrot.lane.b32.xlu1 %v2816_v11, %s2605_s19  ;;  %792 = vrot.lane.b32.xlu0 %v2779_v53, %s2606_s20 }
  0xec   : > { %796 = vrot.lane.b32.xlu1 %v2787_v59, %s2606_s20  ;;  %790 = vrot.lane.b32.xlu0 %v2781_v54, %s2606_s20 }
  0xed   : > { %2159 = vmatmul.mubr.msk.bf16.gmra.mrb[24].mxu1 %vm1156_vm0, %v2389_v57 }
  0xee   : > { %1396 = vmatprep.mubr.bf16.mxu1 %v2602_v18 }
  0xf0   : > { %794 = vrot.lane.b32.xlu1 %v2789_v60, %s2606_s20  ;;  %800 = vrot.lane.b32.xlu0 %v2795_v5, %s2606_s20 }
  0xf4   : > { %804 = vrot.lane.b32.xlu1 %v2801_v7, %s2606_s20  ;;  %798 = vrot.lane.b32.xlu0 %v2797_v6, %s2606_s20 }
  0xf5   : > { %2160 = vmatmul.mubr.msk.bf16.gmra.mrb[28].mxu1 %vm1156_vm0, %v2393_v58 }
  0xf6   : > { %1720 = vmatprep.mubr.bf16.mxu1 %v2602_v18 }
  0xf8   : > { %802 = vrot.lane.b32.xlu1 %v2803_v8, %s2606_s20  ;;  %821 = vrot.lane.b32.xlu0 %v2827_v12, %s2605_s19  ;;  %s3234_s20 = scalar_lea.vmem [#allocation6], %s2099_s25  ;;  %s1882_s19 = scalar_lea.sflag [#allocation5], %s2770_s26 }
  0xfc   : > { %963 = vperm.xlu1 %2342, %v941_v13   ;;  %958 = vperm.xlu0 %2341, %v940_v14  }
 0x100   : > { %973 = vperm.xlu1 %2342, %v943_v15   ;;  %968 = vperm.xlu0 %2341, %v942_v16  }
 0x104   : > { %1003 = vperm.xlu1 %2342, %v949_v17   ;;  %998 = vperm.xlu0 %2341, %v948_v19  }
 0x108   : > { %983 = vperm.xlu1 %2342, %v945_v22   ;;  %978 = vperm.xlu0 %2341, %v944_v23  }
 0x10c   : > { %1013 = vperm.xlu1 %2342, %v951_v26   ;;  %1008 = vperm.xlu0 %2341, %v950_v27  }
 0x110   : > { %993 = vperm.xlu1 %2342, %v947_v28   ;;  %988 = vperm.xlu0 %2341, %v946_v29   ;;  %v2347_v29 = vld [vmem:[%s2833_s18 + $0x4] ss:$8 sps:$4 sm:$0xff]  }
 0x114   : > { %1023 = vperm.xlu1 %2342, %v953_v31   ;;  %1018 = vperm.xlu0 %2341, %v952_v32   ;;  %v2349_v31 = vld [vmem:[%s2833_s18] ss:$8 sps:$4 sm:$0xff]   ;;  %v2350_v32 = vld [vmem:[%s2833_s18 + $0x14] ss:$8 sps:$4 sm:$0xff]  }
 0x118   : > { %1033 = vperm.xlu1 %2342, %v955_v33   ;;  %1028 = vperm.xlu0 %2341, %v954_v34   ;;  %v2352_v33 = vld [vmem:[%s2833_s18 + $0x10] ss:$8 sps:$4 sm:$0xff]   ;;  %v2353_v34 = vld [vmem:[%s2833_s18 + $0x24] ss:$8 sps:$4 sm:$0xff]  }
 0x11c   : > { %1550 = vperm.xlu1 %2342, %v1528_v36   ;;  %1545 = vperm.xlu0 %2341, %v1527_v37   ;;  %v2358_v36 = vld [vmem:[%s2833_s18 + $0x34] ss:$8 sps:$4 sm:$0xff]   ;;  %v2361_v37 = vld [vmem:[%s2833_s18 + $0x30] ss:$8 sps:$4 sm:$0xff]   ;;  %s3224_s18 = scalar_lea.hbm %s3352_s8, %s2181_s12 }
 0x120   : > { %1560 = vperm.xlu1 %2342, %v1530_v38   ;;  %1555 = vperm.xlu0 %2341, %v1529_v39   ;;  %v2362_v38 = vld [vmem:[%s3348_s4] ss:$12 sps:$4 sm:$0xff]   ;;  %v2367_v39 = vld [vmem:[%s3348_s4 + $0x1c] ss:$12 sps:$4 sm:$0xff]  }
 0x124   : > { %1570 = vperm.xlu1 %2342, %v1532_v41   ;;  %1565 = vperm.xlu0 %2341, %v1531_v42   ;;  %v2371_v41 = vld [vmem:[%s3348_s4 + $0x34] ss:$12 sps:$4 sm:$0xff]   ;;  %v2373_v42 = vld [vmem:[%s3348_s4 + $0x30] ss:$12 sps:$4 sm:$0xff]  }
 0x128   : > { %1580 = vperm.xlu1 %2342, %v1534_v43   ;;  %1575 = vperm.xlu0 %2341, %v1533_v44   ;;  %v2375_v43 = vld [vmem:[%s3348_s4 + $0x4c] ss:$12 sps:$4 sm:$0xff]   ;;  %v2377_v44 = vld [vmem:[%s3348_s4 + $0x48] ss:$12 sps:$4 sm:$0xff]  }
 0x12c   : > { %1590 = vperm.xlu1 %2342, %v1536_v46   ;;  %1585 = vperm.xlu0 %2341, %v1535_v47   ;;  %v2381_v46 = vld [vmem:[%s3348_s4 + $0x60] ss:$12 sps:$4 sm:$0xff]   ;;  %v2382_v47 = vld [vmem:[%s3348_s4 + $0x7c] ss:$12 sps:$4 sm:$0xff]  }
 0x130   : > { %1600 = vperm.xlu1 %2342, %v1538_v48   ;;  %1595 = vperm.xlu0 %2341, %v1537_v49   ;;  %v2384_v48 = vld [vmem:[%s3348_s4 + $0x78] ss:$12 sps:$4 sm:$0xff]   ;;  %v2386_v49 = vld [vmem:[%s3348_s4 + $0x94] ss:$12 sps:$4 sm:$0xff]  }
 0x134   : > { %1610 = vperm.xlu1 %2342, %v1540_v51   ;;  %1605 = vperm.xlu0 %2341, %v1539_v52   ;;  %v2390_v51 = vld [vmem:[%s3348_s4 + $0xac] ss:$12 sps:$4 sm:$0xff]   ;;  %v2392_v52 = vld [vmem:[%s3348_s4 + $0xa8] ss:$12 sps:$4 sm:$0xff]  }
 0x138   : > { %1620 = vperm.xlu1 %2342, %v1542_v55   ;;  %1615 = vperm.xlu0 %2341, %v1541_v56   ;;  %v1328_v55 = vpop.f32.mrb[0].mxu1 }
 0x139   : > { %v1330_v56 = vpop.f32.mrb[1].mxu1 }
 0x13a   : > { %v1332_v57 = vpop.f32.mrb[2].mxu1 }
 0x13b   : > { %v1334_v58 = vpop.f32.mrb[3].mxu1 }
 0x146   : > { %v751_v61 = vpop.permute.xlu1 %750  ;;  %v749_v62 = vpop.permute.xlu0 %748 }
 0x147   : > { %v765_v63 = vsel %vm764_vm1, %v749_v62, %v751_v61  ;;  %v776_v0 = vsel %vm764_vm1, %v2808_v9, %v749_v62  ;;  %v1338_v61 = vpop.f32.mrb[4].mxu1 }
 0x148   : > { %1181 = vmatprep.subr.bf16.mxu0 %v765_v63  ;;  %v1340_v62 = vpop.f32.mrb[5].mxu1 }
 0x149   : > { %1182 = vmatpush1.bf16.msra.mxu0 %v776_v0  ;;  %v1342_v63 = vpop.f32.mrb[6].mxu1 }
 0x14a   : > { %v755_v1 = vpop.permute.xlu1 %754  ;;  %v753_v2 = vpop.permute.xlu0 %752 }
 0x14b   : > { %v766_v3 = vsel %vm764_vm1, %v753_v2, %v755_v1  ;;  %v780_v4 = vsel %vm764_vm1, %v2811_v10, %v753_v2  ;;  %v1344_v0 = vpop.f32.mrb[7].mxu1 }
 0x14c   : > { %1183 = vmatprep.subr.bf16.mxu0 %v766_v3 }
 0x14d   : > { %1184 = vmatpush1.bf16.msra.mxu0 %v780_v4 }
 0x14e   : > { %v759_v13 = vpop.permute.xlu1 %758  ;;  %v757_v14 = vpop.permute.xlu0 %756 }
 0x14f   : > { %v767_v15 = vsel %vm764_vm1, %v757_v14, %v759_v13  ;;  %v784_v16 = vsel %vm764_vm1, %v2816_v11, %v757_v14 }
 0x150   : > { %1185 = vmatprep.subr.bf16.mxu0 %v767_v15 }
 0x151   : > { %1186 = vmatpush1.bf16.msra.mxu0 %v784_v16 }
 0x152   : > { %v763_v9 = vpop.permute.xlu1 %762  ;;  %v761_v17 = vpop.permute.xlu0 %760 }
 0x153   : > { %v768_v19 = vsel %vm764_vm1, %v761_v17, %v763_v9  ;;  %v788_v20 = vsel %vm764_vm1, %v2827_v12, %v761_v17 }
 0x154   : > { %1187 = vmatprep.subr.bf16.mxu0 %v768_v19 }
 0x155   : > { %1188 = vmatpush1.bf16.msra.mxu0 %v788_v20 }
 0x156   : > { %v816_v10 = vpop.permute.xlu1 %815  ;;  %1189 = vmatprep.subr.bf16.mxu0 %v2779_v53  ;;  %v818_v21 = vpop.permute.xlu0 %817 }
 0x159   : > { %1190 = vmatpush1.bf16.msra.mxu0 %v2781_v54 }
 0x15a   : > { %v820_v22 = vpop.permute.xlu1 %819  ;;  %1191 = vmatprep.subr.bf16.mxu0 %v2787_v59  ;;  %v793_v11 = vpop.permute.xlu0 %792 }
 0x15b   : > { %v826_v54 = vsel %vm806_vm2, %v793_v11, %v816_v10 }
 0x15d   : > { %1192 = vmatpush1.bf16.msra.mxu0 %v2789_v60 }
 0x15e   : > { %1193 = vmatprep.subr.bf16.mxu0 %v2795_v5  ;;  %v791_v23 = vpop.permute.xlu0 %790  ;;  %v797_v24 = vpop.permute.xlu1 %796 }
 0x15f   : > { %v807_v60 = vsel %vm806_vm2, %v791_v23, %v793_v11  ;;  %v830_v5 = vsel %vm806_vm2, %v797_v24, %v818_v21 }
 0x161   : > { %1194 = vmatpush1.bf16.msra.mxu0 %v2797_v6 }
 0x162   : > { %1195 = vmatprep.subr.bf16.mxu0 %v2801_v7  ;;  %v801_v12 = vpop.permute.xlu0 %800  ;;  %v795_v53 = vpop.permute.xlu1 %794 }
 0x163   : > { %v808_v7 = vsel %vm806_vm2, %v795_v53, %v797_v24 }
 0x165   : > { %1196 = vmatpush1.bf16.msra.mxu0 %v2803_v8  ;;  %v834_v8 = vsel %vm806_vm2, %v801_v12, %v820_v22 }
 0x166   : > { %1197 = vmatprep.subr.bf16.mxu0 %v826_v54  ;;  %v799_v59 = vpop.permute.xlu0 %798  ;;  %v805_v6 = vpop.permute.xlu1 %804 }
 0x167   : > { %v809_v26 = vsel %vm806_vm2, %v799_v59, %v801_v12 }
 0x169   : > { %1198 = vmatpush1.bf16.msra.mxu0 %v807_v60 }
 0x16a   : > { %1199 = vmatprep.subr.bf16.mxu0 %v830_v5  ;;  %v822_v25 = vpop.permute.xlu0 %821  ;;  %v803_v27 = vpop.permute.xlu1 %802 }
 0x16b   : > { %v838_v28 = vsel %vm806_vm2, %v805_v6, %v822_v25  ;;  %v810_v30 = vsel %vm806_vm2, %v803_v27, %v805_v6 }
 0x16d   : > { %1200 = vmatpush1.bf16.msra.mxu0 %v808_v7 }
 0x16e   : > { %1201 = vmatprep.subr.bf16.mxu0 %v834_v8 }
 0x171   : > { %1202 = vmatpush1.bf16.msra.mxu0 %v809_v26 }
 0x172   : > { %1203 = vmatprep.subr.bf16.mxu0 %v838_v28 }
 0x175   : > { %1204 = vmatpush1.bf16.msra.mxu0 %v810_v30 }
 0x176   : > { %1205 = vmatprep.subr.bf16.mxu0 %v2347_v29 }
 0x179   : > { %1206 = vmatpush1.bf16.msra.mxu0 %v2349_v31 }
 0x17a   : > { %1207 = vmatprep.subr.bf16.mxu0 %v2350_v32 }
 0x17b   : > { %v959_v6 = vpop.permute.xlu0 %958  ;;  %v964_v7 = vpop.permute.xlu1 %963 }
 0x17d   : > { %1208 = vmatpush1.bf16.msra.mxu0 %v2352_v33 }
 0x17e   : > { %1209 = vmatprep.subr.bf16.mxu0 %v2353_v34 }
 0x17f   : > { %v969_v8 = vpop.permute.xlu0 %968  ;;  %v974_v28 = vpop.permute.xlu1 %973 }
 0x181   : > { %1210 = vmatpush1.bf16.msra.mxu0 %v2355_v35 }
 0x182   : > { %1211 = vmatprep.subr.bf16.mxu0 %v2358_v36 }
 0x185   : > { %1212 = vmatpush1.bf16.msra.mxu0 %v2361_v37  ;;  %v999_v37 = vpop.permute.xlu0 %998 }
 0x188   : > { %1214 = vmatmul.mubr.bf16.vlgmr.msra.gmra.mrb[0].mxu0 %v2362_v38 }
 0x189   : > { %1223 = vmatprep.mubr.bf16.mxu0 %v2367_v39  ;;  %v3102_v39 = vpop.permute.xlu1 %1003 }
 0x190   : > { %1224 = vmatmul.mubr.bf16.gmra.mrb[4].mxu0 %v2369_v40 }
 0x191   : > { %1233 = vmatprep.mubr.bf16.mxu0 %v2371_v41 }
 0x198   : > { %1234 = vmatmul.mubr.bf16.gmra.mrb[8].mxu0 %v2373_v42 }
 0x199   : > { %1243 = vmatprep.mubr.bf16.mxu0 %v2375_v43 }
 0x1a0   : > { %1244 = vmatmul.mubr.bf16.gmra.mrb[12].mxu0 %v2377_v44  ;;  %v1348_v1 = vpop.f32.mrb[8].mxu1 }
 0x1a1   : > { %1253 = vmatprep.mubr.bf16.mxu0 %v2379_v45  ;;  %v3056_v2 = vpop.f32.mrb[9].mxu1 }
 0x1a2   : > { %v3058_v3 = vpop.f32.mrb[10].mxu1 }
 0x1a3   : > { %v3060_v4 = vpop.f32.mrb[11].mxu1 }
 0x1a8   : > { %1254 = vmatmul.mubr.bf16.gmra.mrb[16].mxu0 %v2381_v46  ;;  %v3062_v13 = vpop.f32.mrb[12].mxu1 }
 0x1a9   : > { %1263 = vmatprep.mubr.bf16.mxu0 %v2382_v47  ;;  %v3064_v14 = vpop.f32.mrb[13].mxu1 }
 0x1aa   : > { %v3066_v15 = vpop.f32.mrb[14].mxu1 }
 0x1ab   : > { %v3068_v16 = vpop.f32.mrb[15].mxu1 }
 0x1b0   : > { %1264 = vmatmul.mubr.bf16.gmra.mrb[20].mxu0 %v2384_v48  ;;  %v3070_v9 = vpop.f32.mrb[16].mxu1  ;;  %v979_v48 = vpop.permute.xlu0 %978 }
 0x1b1   : > { %1273 = vmatprep.mubr.bf16.mxu0 %v2386_v49  ;;  %v3072_v17 = vpop.f32.mrb[17].mxu1 }
 0x1b2   : > { %v3074_v19 = vpop.f32.mrb[18].mxu1 }
 0x1b3   : > { %v3076_v20 = vpop.f32.mrb[19].mxu1 }
 0x1b8   : > { %1274 = vmatmul.mubr.bf16.gmra.mrb[24].mxu0 %v2388_v50  ;;  %v3078_v10 = vpop.f32.mrb[20].mxu1 }
 0x1b9   : > { %1283 = vmatprep.mubr.bf16.mxu0 %v2390_v51  ;;  %v3080_v21 = vpop.f32.mrb[21].mxu1 }
 0x1ba   : > { %v3082_v22 = vpop.f32.mrb[22].mxu1 }
 0x1bb   : > { %v3084_v11 = vpop.f32.mrb[23].mxu1 }
 0x1c0   : > { %1284 = vmatmul.mubr.bf16.gmra.mrb[28].mxu0 %v2392_v52  ;;  %v3086_v23 = vpop.f32.mrb[24].mxu1  ;;  %v984_v52 = vpop.permute.xlu1 %983 }
 0x1c1   : > { %v3088_v24 = vpop.f32.mrb[25].mxu1 }
 0x1c2   : > { %v3090_v12 = vpop.f32.mrb[26].mxu1 }
 0x1c3   : > { %v3092_v53 = vpop.f32.mrb[27].mxu1 }
 0x1c8   : > { %v3094_v54 = vpop.f32.mrb[28].mxu1 }
 0x1c9   : > { %v3096_v59 = vpop.f32.mrb[29].mxu1 }
 0x1ca   : > { %v3098_v60 = vpop.f32.mrb[30].mxu1 }
 0x1cb   : > { %v3100_v5 = vpop.f32.mrb[31].mxu1 }
 0x25b   : > { %v1215_v25 = vpop.f32.mrb[0].mxu0 }
 0x25c   : > { %v1216_v26 = vadd.f32 %v1215_v25, %v959_v6  ;;  %v1217_v27 = vpop.f32.mrb[1].mxu0 }
 0x25d   : > { %v1218_v29 = vadd.f32 %v1217_v27, %v959_v6  ;;  %v1219_v30 = vpop.f32.mrb[2].mxu0 }
 0x25e   : > { %v1329_v31 = vadd.f32 %v1328_v55, %v1216_v26  ;;  %v1220_v32 = vadd.f32 %v1219_v30, %v964_v7  ;;  %v1221_v33 = vpop.f32.mrb[3].mxu0 }
 0x25f   : > { %v1331_v34 = vadd.f32 %v1330_v56, %v1218_v29  ;;  %v1222_v35 = vadd.f32 %v1221_v33, %v964_v7  ;;  %v3106_v29 = vpop.permute.xlu1 %1013 }
 0x260   : > { %v1333_v36 = vadd.f32 %v1332_v57, %v1220_v32 }
 0x261   : > { %v1335_v38 = vadd.f32 %v1334_v58, %v1222_v35  ;;  %v3104_v58 = vpop.permute.xlu0 %1008  ;;  %v1408_v32 = vmul.f32 0.5, %v1331_v34 }
 0x262   : > { %v1409_v35 = vmul.f32 0.5, %v1333_v36 }
 0x263   : > { %v1225_v40 = vpop.f32.mrb[4].mxu0 }
 0x264   : > { %v1226_v41 = vadd.f32 %v1225_v40, %v969_v8  ;;  %v1227_v42 = vpop.f32.mrb[5].mxu0 }
 0x265   : > { %v1228_v43 = vadd.f32 %v1227_v42, %v969_v8  ;;  %v1229_v44 = vpop.f32.mrb[6].mxu0  ;;  %v994_v42 = vpop.permute.xlu1 %993 }
 0x266   : > { %v1339_v45 = vadd.f32 %v1338_v61, %v1226_v41  ;;  %v1230_v46 = vadd.f32 %v1229_v44, %v974_v28  ;;  %v1231_v47 = vpop.f32.mrb[7].mxu0 }
 0x267   : > { %v1341_v49 = vadd.f32 %v1340_v62, %v1228_v43  ;;  %v1232_v50 = vadd.f32 %v1231_v47, %v974_v28  ;;  %v989_v28 = vpop.permute.xlu0 %988 }
 0x268   : > { %v1343_v51 = vadd.f32 %v1342_v63, %v1230_v46 }
 0x269   : > { %v1345_v55 = vadd.f32 %v1344_v0, %v1232_v50  ;;  %v1407_v0 = vmul.f32 0.5, %v1329_v31  ;;  %v1411_v31 = vmul.f32 0.5, %v1339_v45  ;;  %v1412_v36 = vmul.f32 0.5, %v1341_v49 }
 0x26b   : > { %v1235_v56 = vpop.f32.mrb[8].mxu0  ;;  %2402 = vtanh.f32 %v1407_v0 }
 0x26c   : > { %v1236_v57 = vadd.f32 %v1235_v56, %v979_v48  ;;  %v1237_v6 = vpop.f32.mrb[9].mxu0  ;;  %2404 = vtanh.f32 %v1408_v32 }
 0x26d   : > { %v1238_v7 = vadd.f32 %v1237_v6, %v979_v48  ;;  %v1239_v25 = vpop.f32.mrb[10].mxu0  ;;  %2406 = vtanh.f32 %v1409_v35  ;;  %v1413_v48 = vmul.f32 0.5, %v1343_v51 }
 0x26e   : > { %v1349_v26 = vadd.f32 %v1348_v1, %v1236_v57  ;;  %v1240_v27 = vadd.f32 %v1239_v25, %v984_v52  ;;  %v1241_v8 = vpop.f32.mrb[11].mxu0  ;;  %v1410_v1 = vmul.f32 0.5, %v1335_v38 }
 0x26f   : > { %v1351_v61 = vadd.f32 %v3056_v2, %v1238_v7  ;;  %v1242_v30 = vadd.f32 %v1241_v8, %v984_v52 }
 0x270   : > { %v1353_v62 = vadd.f32 %v3058_v3, %v1240_v27  ;;  %2408 = vtanh.f32 %v1410_v1 }
 0x271   : > { %v1355_v63 = vadd.f32 %v3060_v4, %v1242_v30  ;;  %2410 = vtanh.f32 %v1411_v31  ;;  %v1416_v27 = vmul.f32 0.5, %v1351_v61 }
 0x272   : > { %2412 = vtanh.f32 %v1412_v36 }
 0x273   : > { %v1245_v33 = vpop.f32.mrb[12].mxu0  ;;  %2414 = vtanh.f32 %v1413_v48  ;;  %v1418_v0 = vmul.f32 0.5, %v1355_v63 }
 0x274   : > { %v1246_v40 = vadd.f32 %v1245_v33, %v989_v28  ;;  %v1247_v41 = vpop.f32.mrb[13].mxu0 }
 0x275   : > { %v1248_v43 = vadd.f32 %v1247_v41, %v989_v28  ;;  %v1249_v44 = vpop.f32.mrb[14].mxu0  ;;  %v2403_v51 = vpop.eup %2402 }
 0x276   : > { %v3112_v46 = vadd.f32 %v3062_v13, %v1246_v40  ;;  %v1250_v2 = vadd.f32 %v1249_v44, %v994_v42  ;;  %v1251_v47 = vpop.f32.mrb[15].mxu0  ;;  %v1414_v13 = vmul.f32 0.5, %v1345_v55  ;;  %v1415_v55 = vmul.f32 0.5, %v1349_v26  ;;  %v2405_v25 = vpop.eup %2404 }
 0x277   : > { %v3115_v3 = vadd.f32 %v3064_v14, %v1248_v43  ;;  %v1252_v4 = vadd.f32 %v1251_v47, %v994_v42  ;;  %v2407_v8 = vpop.eup %2406  ;;  %v1440_v32 = vmul.f32 0.5, %v2405_v25 }
 0x278   : > { %v3118_v34 = vadd.f32 %v3066_v15, %v1250_v2  ;;  %2416 = vtanh.f32 %v1414_v13  ;;  %v1441_v33 = vmul.f32 0.5, %v2407_v8  ;;  %v1419_v2 = vmul.f32 0.5, %v3112_v46 }
 0x279   : > { %v3121_v38 = vadd.f32 %v3068_v16, %v1252_v4  ;;  %v1456_v4 = vadd.f32 0.5, %v1440_v32  ;;  %v1420_v31 = vmul.f32 0.5, %v3115_v3 }
 0x27a   : > { %v2409_v30 = vpop.eup %2408  ;;  %v1457_v48 = vadd.f32 0.5, %v1441_v33 }
 0x27b   : > { %v1255_v50 = vpop.f32.mrb[16].mxu0  ;;  %v2411_v35 = vpop.eup %2410  ;;  %v1422_v46 = vmul.f32 0.5, %v3121_v38 }
 0x27c   : > { %v1256_v52 = vadd.f32 %v1255_v50, %v999_v37  ;;  %v1257_v56 = vpop.f32.mrb[17].mxu0  ;;  %v2413_v41 = vpop.eup %2412 }
 0x27d   : > { %v1258_v14 = vadd.f32 %v1257_v56, %v999_v37  ;;  %v1259_v57 = vpop.f32.mrb[18].mxu0  ;;  %v2415_v43 = vpop.eup %2414 }
 0x27e   : > { %v1369_v45 = vadd.f32 %v3070_v9, %v1256_v52  ;;  %v1260_v15 = vadd.f32 %v1259_v57, %v3102_v39  ;;  %v1261_v6 = vpop.f32.mrb[19].mxu0  ;;  %v1417_v9 = vmul.f32 0.5, %v1353_v62  ;;  %v1019_v50 = vpop.permute.xlu0 %1018  ;;  %v1443_v52 = vmul.f32 0.5, %v2411_v35 }
 0x27f   : > { %v1371_v49 = vadd.f32 %v3072_v17, %v1258_v14  ;;  %v1262_v16 = vadd.f32 %v1261_v6, %v3102_v39  ;;  %v1439_v17 = vmul.f32 0.5, %v2403_v51  ;;  %v1444_v57 = vmul.f32 0.5, %v2413_v41  ;;  %v1024_v6 = vpop.permute.xlu1 %1023 }
 0x280   : > { %2418 = vtanh.f32 %v1369_v45  ;;  %v1373_v7 = vadd.f32 %v3074_v19, %v1260_v15  ;;  %v1459_v32 = vadd.f32 0.5, %v1443_v52 }
 0x281   : > { %2420 = vtanh.f32 %v1371_v49  ;;  %v1375_v37 = vadd.f32 %v3076_v20, %v1262_v16  ;;  %v1442_v20 = vmul.f32 0.5, %v2409_v30  ;;  %v1455_v44 = vadd.f32 0.5, %v1439_v17 }
 0x282   : > { %2422 = vtanh.f32 %v1373_v7  ;;  %v2417_v47 = vpop.eup %2416  ;;  %v1445_v49 = vmul.f32 0.5, %v2415_v43  ;;  %v1029_v35 = vpop.permute.xlu0 %1028 }
 0x283   : > { %2424 = vtanh.f32 %v1375_v37  ;;  %v1265_v28 = vpop.f32.mrb[20].mxu0  ;;  %v1458_v13 = vadd.f32 0.5, %v1442_v20  ;;  %v1034_v43 = vpop.permute.xlu1 %1033 }
 0x284   : > { %2426 = vtanh.f32 %v1415_v55  ;;  %v1266_v39 = vadd.f32 %v1265_v28, %v3104_v58  ;;  %v1267_v26 = vpop.f32.mrb[21].mxu0  ;;  %v1446_v28 = vmul.f32 0.5, %v2417_v47  ;;  %v1461_v20 = vadd.f32 0.5, %v1445_v49 }
 0x285   : > { %2428 = vtanh.f32 %v1416_v27  ;;  %v1268_v19 = vadd.f32 %v1267_v26, %v3104_v58  ;;  %v1269_v61 = vpop.f32.mrb[22].mxu0 }
 0x286   : > { %2430 = vtanh.f32 %v1417_v9  ;;  %v1270_v62 = vadd.f32 %v1269_v61, %v3106_v29  ;;  %v1379_v63 = vadd.f32 %v3078_v10, %v1266_v39  ;;  %v1271_v40 = vpop.f32.mrb[23].mxu0 }
 0x287   : > { %2432 = vtanh.f32 %v1418_v0  ;;  %v1272_v42 = vadd.f32 %v1271_v40, %v3106_v29  ;;  %v1381_v1 = vadd.f32 %v3080_v21, %v1268_v19  ;;  %v1421_v29 = vmul.f32 0.5, %v3118_v34 }
 0x288   : > { %2434 = vtanh.f32 %v1379_v63  ;;  %v1383_v58 = vadd.f32 %v3082_v22, %v1270_v62  ;;  %v1460_v19 = vadd.f32 0.5, %v1444_v57  ;;  %v1462_v40 = vadd.f32 0.5, %v1446_v28 }
 0x289   : > { %2436 = vtanh.f32 %v1381_v1  ;;  %v1385_v10 = vadd.f32 %v3084_v11, %v1272_v42 }
 0x28a   : > { %v2419_v36 = vpop.eup %2418  ;;  %2438 = vtanh.f32 %v1383_v58 }
 0x28b   : > { %v2421_v21 = vpop.eup %2420  ;;  %2440 = vtanh.f32 %v1385_v10  ;;  %v1275_v22 = vpop.f32.mrb[24].mxu0  ;;  %v1487_v56 = vmul.f32 %v2419_v36, %v1455_v44 }
 0x28c   : > { %v2423_v14 = vpop.eup %2422  ;;  %2442 = vtanh.f32 %v1419_v2  ;;  %v1276_v3 = vadd.f32 %v1275_v22, %v1019_v50  ;;  %v1277_v45 = vpop.f32.mrb[25].mxu0  ;;  %v1488_v11 = vmul.f32 %v2421_v21, %v1456_v4 }
 0x28d   : > { %v2425_v15 = vpop.eup %2424  ;;  %2444 = vtanh.f32 %v1420_v31  ;;  %v1278_v34 = vadd.f32 %v1277_v45, %v1019_v50  ;;  %v1279_v16 = vpop.f32.mrb[26].mxu0  ;;  %v1489_v51 = vmul.f32 %v2423_v14, %v1457_v48 }
 0x28e   : > { %v2427_v55 = vpop.eup %2426  ;;  %2446 = vtanh.f32 %v1421_v29  ;;  %v1280_v7 = vadd.f32 %v1279_v16, %v1024_v6  ;;  %v1389_v38 = vadd.f32 %v3086_v23, %v1276_v3  ;;  %v1281_v25 = vpop.f32.mrb[27].mxu0  ;;  %v1490_v27 = vmul.f32 %v2425_v15, %v1458_v13 }
 0x28f   : > { %v2429_v37 = vpop.eup %2428  ;;  %2448 = vtanh.f32 %v1422_v46  ;;  %v1282_v8 = vadd.f32 %v1281_v25, %v1024_v6  ;;  %v1391_v9 = vadd.f32 %v3088_v24, %v1278_v34  ;;  %v1519_v30 = vpack.c.bf16 %v1489_v51, %v1487_v56 }
 0x290   : > { %v2431_v0 = vpop.eup %2430  ;;  %2450 = vtanh.f32 %v1389_v38  ;;  %v1393_v17 = vadd.f32 %v3090_v12, %v1280_v7  ;;  %v1520_v39 = vpack.c.bf16 %v1490_v27, %v1488_v11  ;;  %v1447_v44 = vmul.f32 0.5, %v2427_v55 }
 0x291   : > { %v2433_v26 = vpop.eup %2432  ;;  %2452 = vtanh.f32 %v1391_v9  ;;  %v1395_v33 = vadd.f32 %v3092_v53, %v1282_v8  ;;  %v1448_v4 = vmul.f32 0.5, %v2429_v37  ;;  %v1449_v29 = vmul.f32 0.5, %v2431_v0 }
 0x292   : > { %v2435_v23 = vpop.eup %2434  ;;  %2454 = vtanh.f32 %v1393_v17  ;;  %1688 = vmatprep.subr.bf16.mxu1 %v1520_v39  ;;  %v1450_v22 = vmul.f32 0.5, %v2433_v26  ;;  %v1463_v3 = vadd.f32 0.5, %v1447_v44  ;;  %v1546_v44 = vpop.permute.xlu0 %1545 }
 0x293   : > { %v2437_v61 = vpop.eup %2436  ;;  %2456 = vtanh.f32 %v1395_v33  ;;  %v1285_v24 = vpop.f32.mrb[28].mxu0  ;;  %1689 = vmatpush1.bf16.msra.mxu1 %v1519_v30  ;;  %v1491_v62 = vmul.f32 %v2435_v23, %v1459_v32  ;;  %v1464_v11 = vadd.f32 0.5, %v1448_v4  ;;  %v1465_v6 = vadd.f32 0.5, %v1449_v29  ;;  %v2467_v4 = vld [vmem:[%s2773_s22 + $0x8] sm:$0xff] }
 0x294   : > { %v2439_v63 = vpop.eup %2438  ;;  %v1286_v12 = vadd.f32 %v1285_v24, %v1029_v35  ;;  %v1287_v41 = vpop.f32.mrb[29].mxu0  ;;  %v1492_v42 = vmul.f32 %v2437_v61, %v1460_v19  ;;  %v1466_v34 = vadd.f32 0.5, %v1450_v22  ;;  %v2395_v24 = vld [vmem:[%s3349_s5 + $0x8] sm:$0xff]  }
 0x295   : > { %v2441_v1 = vpop.eup %2440  ;;  %v1288_v53 = vadd.f32 %v1287_v41, %v1029_v35  ;;  %v1289_v2 = vpop.f32.mrb[30].mxu0  ;;  %v1493_v58 = vmul.f32 %v2439_v63, %v1461_v20  ;;  %v2394_v20 = vld [vmem:[%s3349_s5] sm:$0xff]   ;;  %v2397_v63 = vld [vmem:[%s3349_s5 + $0x18] sm:$0xff]   ;;  %v2400_v41 = vld [vmem:[%s3349_s5 + $0x30] sm:$0xff]  }
 0x296   : > { %v2443_v47 = vpop.eup %2442  ;;  %v1290_v31 = vadd.f32 %v1289_v2, %v1034_v43  ;;  %v1399_v10 = vadd.f32 %v3094_v54, %v1286_v12  ;;  %v1291_v36 = vpop.f32.mrb[31].mxu0  ;;  %v1494_v48 = vmul.f32 %v2441_v1, %v1462_v40  ;;  %v2398_v40 = vld [vmem:[%s3349_s5 + $0x20] sm:$0xff]   ;;  %v2399_v12 = vld [vmem:[%s3349_s5 + $0x28] sm:$0xff]  }
 0x297   : > { %v2445_v13 = vpop.eup %2444  ;;  %v1292_v21 = vadd.f32 %v1291_v36, %v1034_v43  ;;  %v1401_v50 = vadd.f32 %v3096_v59, %v1288_v53  ;;  %v1521_v52 = vpack.c.bf16 %v1493_v58, %v1491_v62  ;;  %v2396_v62 = vld [vmem:[%s3349_s5 + $0x10] sm:$0xff]   ;;  %v2466_v1 = vld [vmem:[%s2773_s22] sm:$0xff] }
 0x298   : > { %v2447_v46 = vpop.eup %2446  ;;  %2458 = vtanh.f32 %v1399_v10  ;;  %v1403_v56 = vadd.f32 %v3098_v60, %v1290_v31  ;;  %v1522_v14 = vpack.c.bf16 %v1494_v48, %v1492_v42  ;;  %v1451_v60 = vmul.f32 0.5, %v2443_v47  ;;  %v2401_v42 = vld [vmem:[%s3349_s5 + $0x38] sm:$0xff]   ;;  %v1551_v10 = vpop.permute.xlu1 %1550 }
 0x299   : > { %v2449_v57 = vpop.eup %2448  ;;  %2460 = vtanh.f32 %v1401_v50  ;;  %v1405_v45 = vadd.f32 %v3100_v5, %v1292_v21  ;;  %v1452_v7 = vmul.f32 0.5, %v2445_v13  ;;  %v1453_v25 = vmul.f32 0.5, %v2447_v46 }
 0x29a   : > { %v2451_v54 = vpop.eup %2450  ;;  %2462 = vtanh.f32 %v1403_v56  ;;  %1690 = vmatprep.subr.bf16.mxu1 %v1522_v14  ;;  %v1454_v5 = vmul.f32 0.5, %v2449_v57  ;;  %v1467_v8 = vadd.f32 0.5, %v1451_v60  ;;  %v1801_v43 = vunpack.c.l.bf16 %v2466_v1 }
 0x29b   : > { %v2453_v15 = vpop.eup %2452  ;;  %2464 = vtanh.f32 %v1405_v45  ;;  %1691 = vmatpush1.bf16.msra.mxu1 %v1521_v52  ;;  %v1495_v59 = vmul.f32 %v2451_v54, %v1463_v3  ;;  %v1468_v30 = vadd.f32 0.5, %v1452_v7  ;;  %v1469_v28 = vadd.f32 0.5, %v1453_v25  ;;  %v2468_v3 = vld [vmem:[%s2773_s22 + $0x10] sm:$0xff]  ;;  %v1556_v54 = vpop.permute.xlu0 %1555 }
 0x29c   : > { %v2455_v49 = vpop.eup %2454  ;;  %v1496_v16 = vmul.f32 %v2453_v15, %v1464_v11  ;;  %v1470_v26 = vadd.f32 0.5, %v1454_v5  ;;  %v1802_v2 = vunpack.c.h.bf16 %v2466_v1  ;;  %v1803_v31 = vunpack.c.l.bf16 %v2467_v4 }
 0x29d   : > { %v2457_v51 = vpop.eup %2456  ;;  %v1497_v55 = vmul.f32 %v2455_v49, %v1465_v6  ;;  %v1804_v48 = vunpack.c.h.bf16 %v2467_v4  ;;  %v1805_v45 = vunpack.c.l.bf16 %v2468_v3  ;;  %v1806_v6 = vunpack.c.h.bf16 %v2468_v3  ;;  %v2472_v4 = vld [vmem:[%s2773_s22 + $0x30] sm:$0xff] }
 0x29e   : > { %v1498_v38 = vmul.f32 %v2457_v51, %v1466_v34  ;;  %v2469_v34 = vld [vmem:[%s2773_s22 + $0x18] sm:$0xff]  ;;  %v1561_v51 = vpop.permute.xlu1 %1560 }
 0x29f   : > { %v1523_v27 = vpack.c.bf16 %v1497_v55, %v1495_v59  ;;  %v1808_v7 = vunpack.c.h.bf16 %v2469_v34 }
 0x2a0   : > { %v1524_v37 = vpack.c.bf16 %v1498_v38, %v1496_v16  ;;  %v1807_v16 = vunpack.c.l.bf16 %v2469_v34 }
 0x2a2   : > { %v2459_v9 = vpop.eup %2458  ;;  %1692 = vmatprep.subr.bf16.mxu1 %v1524_v37 }
 0x2a3   : > { %v2461_v0 = vpop.eup %2460  ;;  %1693 = vmatpush1.bf16.msra.mxu1 %v1523_v27  ;;  %v1499_v17 = vmul.f32 %v2459_v9, %v1467_v8 }
 0x2a4   : > { %v2463_v39 = vpop.eup %2462  ;;  %v1500_v32 = vmul.f32 %v2461_v0, %v1468_v30 }
 0x2a5   : > { %v2465_v33 = vpop.eup %2464  ;;  %v1501_v23 = vmul.f32 %v2463_v39, %v1469_v28 }
 0x2a6   : > { %v1502_v19 = vmul.f32 %v2465_v33, %v1470_v26  ;;  %v1566_v26 = vpop.permute.xlu0 %1565 }
 0x2a7   : > { %v1525_v61 = vpack.c.bf16 %v1501_v23, %v1499_v17  ;;  %v2470_v17 = vld [vmem:[%s2773_s22 + $0x20] sm:$0xff] }
 0x2a8   : > { %v1526_v35 = vpack.c.bf16 %v1502_v19, %v1500_v32  ;;  %v1809_v39 = vunpack.c.l.bf16 %v2470_v17  ;;  %v1810_v23 = vunpack.c.h.bf16 %v2470_v17 }
 0x2aa   : > { %1694 = vmatprep.subr.bf16.mxu1 %v1526_v35  ;;  %v2471_v35 = vld [vmem:[%s2773_s22 + $0x28] sm:$0xff] }
 0x2ab   : > { %1695 = vmatpush1.bf16.msra.mxu1 %v1525_v61 }
 0x2ae   : > { %2169 = vmatmul.mubr.msk.bf16.vlgmr.msra.gmra.mrb[32].mxu1 %vm1663_vm3, %v2394_v20  ;;  %v1811_v20 = vunpack.c.l.bf16 %v2471_v35 }
 0x2af   : > { %1730 = vmatprep.mubr.bf16.mxu1 %v2602_v18 }
 0x2b6   : > { %2170 = vmatmul.mubr.msk.bf16.gmra.mrb[36].mxu1 %vm1663_vm3, %v2395_v24  ;;  %v1571_v24 = vpop.permute.xlu1 %1570 }
 0x2b7   : > { %1740 = vmatprep.mubr.bf16.mxu1 %v2602_v18 }
 0x2be   : > { %2171 = vmatmul.mubr.msk.bf16.gmra.mrb[40].mxu1 %vm1663_vm3, %v2396_v62 }
 0x2bf   : > { %1750 = vmatprep.mubr.bf16.mxu1 %v2602_v18 }
 0x2c6   : > { %2172 = vmatmul.mubr.msk.bf16.gmra.mrb[44].mxu1 %vm1663_vm3, %v2397_v63 }
 0x2c7   : > { %1760 = vmatprep.mubr.bf16.mxu1 %v2602_v18 }
 0x2ce   : > { %2173 = vmatmul.mubr.msk.bf16.gmra.mrb[48].mxu1 %vm1663_vm3, %v2398_v40  ;;  %v1812_v40 = vunpack.c.h.bf16 %v2471_v35 }
 0x2cf   : > { %1770 = vmatprep.mubr.bf16.mxu1 %v2602_v18 }
 0x2d6   : > { %2174 = vmatmul.mubr.msk.bf16.gmra.mrb[52].mxu1 %vm1663_vm3, %v2399_v12 }
 0x2d7   : > { %1780 = vmatprep.mubr.bf16.mxu1 %v2602_v18 }
 0x2de   : > { %2175 = vmatmul.mubr.msk.bf16.gmra.mrb[56].mxu1 %vm1663_vm3, %v2400_v41 }
 0x2df   : > { %1790 = vmatprep.mubr.bf16.mxu1 %v2602_v18 }
 0x2e6   : > { %2176 = vmatmul.mubr.msk.bf16.gmra.mrb[60].mxu1 %vm1663_vm3, %v2401_v42 }
 0x381   : > { %v1722_v53 = vpop.f32.mrb[32].mxu1 }
 0x382   : > { %v1723_v58 = vadd.f32 %v1722_v53, %v1546_v44  ;;  %v1724_v47 = vpop.f32.mrb[33].mxu1 }
 0x383   : > { %v1725_v18 = vadd.f32 %v1724_v47, %v1546_v44  ;;  %v1726_v36 = vpop.f32.mrb[34].mxu1 }
 0x384   : > { %v1817_v13 = vadd.f32 %v1801_v43, %v1723_v58  ;;  %v1727_v29 = vadd.f32 %v1726_v36, %v1551_v10  ;;  %v1728_v21 = vpop.f32.mrb[35].mxu1 }
 0x385   : > { %v1818_v50 = vadd.f32 %v1802_v2, %v1725_v18  ;;  %v1729_v52 = vadd.f32 %v1728_v21, %v1551_v10  ;;  %v1576_v10 = vpop.permute.xlu0 %1575  ;;  %v2473_v21 = vld [vmem:[%s2773_s22 + $0x38] sm:$0xff] }
 0x386   : > { %v1833_v46 = vmul.f32 0.70710677, %v1817_v13  ;;  %v1819_v22 = vadd.f32 %v1803_v31, %v1727_v29  ;;  %v1813_v31 = vunpack.c.l.bf16 %v2472_v4 }
 0x387   : > { %v1834_v56 = vmul.f32 0.70710677, %v1818_v50  ;;  %v1820_v14 = vadd.f32 %v1804_v48, %v1729_v52  ;;  %v1814_v48 = vunpack.c.h.bf16 %v2472_v4  ;;  %v1815_v50 = vunpack.c.l.bf16 %v2473_v21  ;;  %v1581_v52 = vpop.permute.xlu1 %1580 }
 0x388   : > { %1849 = vst [vmem:[%s3193_s27] sm:$0xff] %v1833_v46  ;;  %v1835_v57 = vmul.f32 0.70710677, %v1819_v22 }
 0x389   : > { %1850 = vst [vmem:[%s3193_s27 + $0x8] sm:$0xff] %v1834_v56  ;;  %v1836_v11 = vmul.f32 0.70710677, %v1820_v14  ;;  %v1732_v15 = vpop.f32.mrb[36].mxu1  ;;  %v1816_v56 = vunpack.c.h.bf16 %v2473_v21  ;;  %v1586_v34 = vpop.permute.xlu0 %1585 }
 0x38a   : > { %1851 = vst [vmem:[%s3193_s27 + $0x10] sm:$0xff] %v1835_v57  ;;  %v1733_v59 = vadd.f32 %v1732_v15, %v1556_v54  ;;  %v1734_v49 = vpop.f32.mrb[37].mxu1 }
 0x38b   : > { %1852 = vst [vmem:[%s3193_s27 + $0x18] sm:$0xff] %v1836_v11  ;;  %v1735_v60 = vadd.f32 %v1734_v49, %v1556_v54  ;;  %v1736_v55 = vpop.f32.mrb[38].mxu1 }
 0x38c   : > { %v1821_v38 = vadd.f32 %v1805_v45, %v1733_v59  ;;  %v1737_v25 = vadd.f32 %v1736_v55, %v1561_v51  ;;  %v1738_v27 = vpop.f32.mrb[39].mxu1 }
 0x38d   : > { %v1822_v5 = vadd.f32 %v1806_v6, %v1735_v60  ;;  %v1739_v37 = vadd.f32 %v1738_v27, %v1561_v51 }
 0x38e   : > { %v1837_v8 = vmul.f32 0.70710677, %v1821_v38  ;;  %v1823_v9 = vadd.f32 %v1807_v16, %v1737_v25 }
 0x38f   : > { %v1838_v30 = vmul.f32 0.70710677, %v1822_v5  ;;  %v1824_v0 = vadd.f32 %v1808_v7, %v1739_v37  ;;  %v1591_v7 = vpop.permute.xlu1 %1590 }
 0x390   : > { %1853 = vst [vmem:[%s3193_s27 + $0x20] sm:$0xff] %v1837_v8  ;;  %v1839_v28 = vmul.f32 0.70710677, %v1823_v9 }
 0x391   : > { %1854 = vst [vmem:[%s3193_s27 + $0x28] sm:$0xff] %v1838_v30  ;;  %v1840_v32 = vmul.f32 0.70710677, %v1824_v0  ;;  %v1742_v33 = vpop.f32.mrb[40].mxu1 }
 0x392   : > { %1855 = vst [vmem:[%s3193_s27 + $0x30] sm:$0xff] %v1839_v28  ;;  %v1743_v19 = vadd.f32 %v1742_v33, %v1566_v26  ;;  %v1744_v61 = vpop.f32.mrb[41].mxu1 }
 0x393   : > { %1856 = vst [vmem:[%s3193_s27 + $0x38] sm:$0xff] %v1840_v32  ;;  %v1745_v62 = vadd.f32 %v1744_v61, %v1566_v26  ;;  %v1746_v63 = vpop.f32.mrb[42].mxu1 }
 0x394   : > { %v1825_v12 = vadd.f32 %v1809_v39, %v1743_v19  ;;  %v1747_v41 = vadd.f32 %v1746_v63, %v1571_v24  ;;  %v1748_v42 = vpop.f32.mrb[43].mxu1 }
 0x395   : > { %v1826_v1 = vadd.f32 %v1810_v23, %v1745_v62  ;;  %v1749_v43 = vadd.f32 %v1748_v42, %v1571_v24 }
 0x396   : > { %v1841_v44 = vmul.f32 0.70710677, %v1825_v12  ;;  %v1827_v53 = vadd.f32 %v1811_v20, %v1747_v41 }
 0x397   : > { %v1842_v2 = vmul.f32 0.70710677, %v1826_v1  ;;  %v1828_v58 = vadd.f32 %v1812_v40, %v1749_v43 }
 0x398   : > { %1857 = vst [vmem:[%s3193_s27 + $0x40] sm:$0xff] %v1841_v44  ;;  %v1843_v47 = vmul.f32 0.70710677, %v1827_v53 }
 0x399   : > { %1858 = vst [vmem:[%s3193_s27 + $0x48] sm:$0xff] %v1842_v2  ;;  %v1844_v18 = vmul.f32 0.70710677, %v1828_v58  ;;  %v1752_v36 = vpop.f32.mrb[44].mxu1 }
 0x39a   : > { %1859 = vst [vmem:[%s3193_s27 + $0x50] sm:$0xff] %v1843_v47  ;;  %v1753_v13 = vadd.f32 %v1752_v36, %v1576_v10  ;;  %v1754_v29 = vpop.f32.mrb[45].mxu1 }
 0x39b   : > { %1860 = vst [vmem:[%s3193_s27 + $0x58] sm:$0xff] %v1844_v18  ;;  %v1755_v46 = vadd.f32 %v1754_v29, %v1576_v10  ;;  %v1756_v22 = vpop.f32.mrb[46].mxu1 }
 0x39c   : > { %v1829_v14 = vadd.f32 %v1813_v31, %v1753_v13  ;;  %v1757_v57 = vadd.f32 %v1756_v22, %v1581_v52  ;;  %v1758_v3 = vpop.f32.mrb[47].mxu1 }
 0x39d   : > { %v1830_v45 = vadd.f32 %v1814_v48, %v1755_v46  ;;  %v1759_v54 = vadd.f32 %v1758_v3, %v1581_v52 }
 0x39e   : > { %v1845_v11 = vmul.f32 0.70710677, %v1829_v14  ;;  %v1831_v15 = vadd.f32 %v1815_v50, %v1757_v57 }
 0x39f   : > { %v1846_v6 = vmul.f32 0.70710677, %v1830_v45  ;;  %v1832_v59 = vadd.f32 %v1816_v56, %v1759_v54 }
 0x3a0   : > { %1861 = vst [vmem:[%s3193_s27 + $0x60] sm:$0xff] %v1845_v11  ;;  %v1847_v49 = vmul.f32 0.70710677, %v1831_v15 }
 0x3a1   : > { %1862 = vst [vmem:[%s3193_s27 + $0x68] sm:$0xff] %v1846_v6  ;;  %v1848_v16 = vmul.f32 0.70710677, %v1832_v59  ;;  %v1762_v51 = vpop.f32.mrb[48].mxu1 }
 0x3a2   : > { %1863 = vst [vmem:[%s3193_s27 + $0x70] sm:$0xff] %v1847_v49  ;;  %v1763_v60 = vadd.f32 %v1762_v51, %v1586_v34  ;;  %v1764_v55 = vpop.f32.mrb[49].mxu1 }
 0x3a3   : > { %1864 = vst [vmem:[%s3193_s27 + $0x78] sm:$0xff] %v1848_v16  ;;  %v1765_v38 = vadd.f32 %v1764_v55, %v1586_v34  ;;  %v1766_v25 = vpop.f32.mrb[50].mxu1  ;;  %s2480_s27 = scalar_lea.vmem %s2479_s29, 4096 }
 0x3a4   : > { %1865 = vst [vmem:[%s3234_s20] sm:$0xff] %v1763_v60  ;;  %v1767_v27 = vadd.f32 %v1766_v25, %v1591_v7  ;;  %v1768_v5 = vpop.f32.mrb[51].mxu1  ;;  %p2482_p6 = scmp.lt.s32.totalorder %s2480_s27, %s2474_s21 }
 0x3a6   : > { %p2483_p7 = por %p2482_p6, %p2481_p5 }
 0x3a8   : > { %p2484_p10 = pnand %p2483_p7, %p2477_p4 }
 0x3aa   : > { %2487 = shalt.err (!%p2484_p10)
}
 0x3ab   : > { %s2488_s25 = scalar_lea.hbm %s3224_s18, 2048  ;;  %s2492_s24 = scalar_lea.hbm %s3352_s8, 8192 }
 0x3ac   : > { %p2489_p11 = scmp.ne.s32.totalorder %s3224_s18, %s2488_s25  ;;  %p2493_p0 = scmp.lt.u32.totalorder %s3224_s18, %s3352_s8 }
 0x3ad   : > { %p2494_p1 = scmp.lt.u32.totalorder %s2492_s24, %s2488_s25  ;;  %p2496_p3 = scmp.lt.u32.totalorder %s2488_s25, %s3224_s18 }
 0x3ae   : > { %p2490_p12 = pnand %p2489_p11, %p2722_p8 }
 0x3af   : > { %p2495_p2 = por %p2494_p1, %p2493_p0 }
 0x3b0   : > { %p2491_p13 = pneg %p2490_p12 }
 0x3b1   : > { %p2497_p4 = por %p2496_p3, %p2495_p2 }
 0x3b3   : > { %p2498_p5 = pnand %p2497_p4, %p2491_p13 }
 0x3b5   : > { %2501 = shalt.err (!%p2498_p5)
}
 0x3b6   : > { %s2608_s21 = smov 256   ;;  %s2609_s27 = smov 512   ;;  %1866 = vst [vmem:[%s3234_s20 + $0x8] sm:$0xff] %v1765_v38  ;;  %v1769_v37 = vadd.f32 %v1768_v5, %v1591_v7  ;;  %1867 = vst [vmem:[%s3234_s20 + $0x10] sm:$0xff] %v1767_v27  ;;  %v1596_v8 = vpop.permute.xlu0 %1595  ;;  %v1772_v9 = vpop.f32.mrb[52].mxu1 }
 0x3b7   : > { %s2610_s17 = smov 16   ;;  %v1773_v30 = vadd.f32 %v1772_v9, %v1596_v8  ;;  %v1774_v0 = vpop.f32.mrb[53].mxu1  ;;  %v1601_v28 = vpop.permute.xlu1 %1600  ;;  %s3283_s25 = scalar_lea.hbm %s3353_s9, %s2181_s12 }
 0x3b8   : > { %2257 = dma.vmem_to_hbm [thread:$0]  (%p2722_p8), %s3227_s13, 2048, %s3224_s18, %s1882_s19, %s2608_s21, %s2609_s27, %s2610_s17   ;;  %v1775_v17 = vadd.f32 %v1774_v0, %v1596_v8  ;;  %v1776_v39 = vpop.f32.mrb[54].mxu1 }
 0x3b9   : > { %1868 = vst [vmem:[%s3234_s20 + $0x18] sm:$0xff] %v1769_v37  ;;  %1869 = vst [vmem:[%s3234_s20 + $0x20] sm:$0xff] %v1773_v30  ;;  %v1777_v26 = vadd.f32 %v1776_v39, %v1601_v28  ;;  %v1778_v32 = vpop.f32.mrb[55].mxu1  ;;  %s1920_s13 = sshll.u32 %s3234_s20, 4  ;;  %s1887_s22 = scalar_lea.sflag [#allocation7], %s2770_s26  ;;  %s3285_s13 = int_to_ptr.vmem [resolvable:$true] %s1920_s13 }
 0x3ba   : > { %1870 = vst [vmem:[%s3234_s20 + $0x28] sm:$0xff] %v1775_v17  ;;  %v1779_v33 = vadd.f32 %v1778_v32, %v1601_v28  ;;  %v1606_v23 = vpop.permute.xlu0 %1605  ;;  %v1782_v19 = vpop.f32.mrb[56].mxu1  ;;  %s2502_s24 = scalar_lea.vmem %s3285_s13, 2048  ;;  %s2611_s0 = smov [#allocation6]  }
 0x3bb   : > { %1871 = vst [vmem:[%s3234_s20 + $0x30] sm:$0xff] %v1777_v26  ;;  %v1783_v61 = vadd.f32 %v1782_v19, %v1606_v23  ;;  %v1784_v35 = vpop.f32.mrb[57].mxu1  ;;  %v1611_v20 = vpop.permute.xlu1 %1610  ;;  %p2503_p6 = scmp.ne.s32.totalorder %s3285_s13, %s2502_s24  ;;  %s2506_s1 = sshll.u32 %s2611_s0, 4  ;;  %s2507_s1 = int_to_ptr.vmem [resolvable:$false] %s2506_s1 }
 0x3bc   : > { %1872 = vst [vmem:[%s3234_s20 + $0x38] sm:$0xff] %v1779_v33  ;;  %v1785_v24 = vadd.f32 %v1784_v35, %v1606_v23  ;;  %v1786_v62 = vpop.f32.mrb[58].mxu1  ;;  %s2508_s29 = scalar_lea.vmem %s2507_s1, 4096  ;;  %p2509_p11 = scmp.lt.s32.totalorder %s3285_s13, %s2507_s1 }
 0x3bd   : > { %1873 = vst [vmem:[%s3234_s20 + $0x40] sm:$0xff] %v1783_v61  ;;  %v1787_v63 = vadd.f32 %v1786_v62, %v1611_v20  ;;  %v1788_v40 = vpop.f32.mrb[59].mxu1  ;;  %p2504_p7 = pnand %p2503_p6, %p2722_p8  ;;  %p2510_p12 = scmp.lt.s32.totalorder %s2508_s29, %s2502_s24 }
 0x3be   : > { %1874 = vst [vmem:[%s3234_s20 + $0x48] sm:$0xff] %v1785_v24  ;;  %v1789_v12 = vadd.f32 %v1788_v40, %v1611_v20  ;;  %v1616_v41 = vpop.permute.xlu0 %1615  ;;  %v1792_v42 = vpop.f32.mrb[60].mxu1 }
 0x3bf   : > { %1875 = vst [vmem:[%s3234_s20 + $0x50] sm:$0xff] %v1787_v63  ;;  %v1793_v1 = vadd.f32 %v1792_v42, %v1616_v41  ;;  %v1794_v43 = vpop.f32.mrb[61].mxu1  ;;  %v1621_v44 = vpop.permute.xlu1 %1620  ;;  %p2505_p10 = pneg %p2504_p7  ;;  %p2511_p13 = por %p2510_p12, %p2509_p11 }
 0x3c0   : > { %1876 = vst [vmem:[%s3234_s20 + $0x58] sm:$0xff] %v1789_v12  ;;  %v1795_v53 = vadd.f32 %v1794_v43, %v1616_v41  ;;  %v1796_v2 = vpop.f32.mrb[62].mxu1 }
 0x3c1   : > { %1877 = vst [vmem:[%s3234_s20 + $0x60] sm:$0xff] %v1793_v1  ;;  %v1797_v58 = vadd.f32 %v1796_v2, %v1621_v44  ;;  %v1798_v47 = vpop.f32.mrb[63].mxu1  ;;  %p2512_p0 = pnand %p2511_p13, %p2505_p10 }
 0x3c2   : > { %1878 = vst [vmem:[%s3234_s20 + $0x68] sm:$0xff] %v1795_v53  ;;  %v1799_v4 = vadd.f32 %v1798_v47, %v1621_v44 }
 0x3c3   : > { %1879 = vst [vmem:[%s3234_s20 + $0x70] sm:$0xff] %v1797_v58 }
 0x3c4   : > { %1880 = vst [vmem:[%s3234_s20 + $0x78] sm:$0xff] %v1799_v4 }
 0x3c5   : > { %2515 = shalt.err (!%p2512_p0)
}
 0x3c6   : > { %s2516_s12 = scalar_lea.hbm %s3283_s25, 2048  ;;  %s2520_s19 = scalar_lea.hbm %s3353_s9, 8192 }
 0x3c7   : > { %p2517_p1 = scmp.ne.s32.totalorder %s3283_s25, %s2516_s12  ;;  %p2521_p4 = scmp.lt.u32.totalorder %s3283_s25, %s3353_s9 }
 0x3c8   : > { %p2522_p5 = scmp.lt.u32.totalorder %s2520_s19, %s2516_s12  ;;  %p2524_p7 = scmp.lt.u32.totalorder %s2516_s12, %s3283_s25 }
 0x3c9   : > { %p2518_p2 = pnand %p2517_p1, %p2722_p8 }
 0x3ca   : > { %p2523_p6 = por %p2522_p5, %p2521_p4 }
 0x3cb   : > { %p2519_p3 = pneg %p2518_p2 }
 0x3cc   : > { %p2525_p10 = por %p2524_p7, %p2523_p6 }
 0x3ce   : > { %p2526_p11 = pnand %p2525_p10, %p2519_p3 }
 0x3d0   : > { %2529 = shalt.err (!%p2526_p11)
}
 0x3d1   : > { %2258 = dma.vmem_to_hbm [thread:$0]  (%p2722_p8), %s3285_s13, 2048, %s3283_s25, %s1887_s22, %s2608_s21, %s2609_s27, %s2610_s17  }
 0x3d2 PF: > { %p2268_p12 = scmp.ge.s32.totalorder %s2600_s16, 2  ;;  %s1935_s29 = sand.u32 1, %s2572_s30  }
 0x3d3   : > { %s1936_s12 = scalar_lea.sflag [#allocation5], %s1935_s29 }
 0x3d4   : > { %p2262_p13 = pnand %p2268_p12, %p2726_p9 }
 0x3d6   : > { %2563 = dma.done.wait (!%p2262_p13), %s1936_s12, 2048  }
 0x3d7   : > { %2565 = vsyncadd (!%p2262_p13), %s1936_s12, 4294965248  ;;  %s1945_s23 = scalar_lea.sflag [#allocation7], %s1935_s29 }
 0x3d8   : > { %2567 = dma.done.wait (!%p2262_p13), %s1945_s23, 2048  }
 0x3d9   : > { %2569 = vsyncadd (!%p2262_p13), %s1945_s23, 4294965248  ;;  %s26_s16 = sadd.s32 1, %s2600_s16   ;;  %s3368_s26 = sld [smem:[#allocation10_spill]] }
 0x3da   : > { %p23_p0 = scmp.ge.s32.totalorder %s26_s16, 6   ;;  %s3369_s21 = sld [smem:[#allocation11_spill]] }
 0x3db   : > { %s3370_s30 = smov %s2576_s10  ;;  %s3371_s10 = smov %s2580_s11 }
 0x3dc   : > { %s3372_s11 = smov %s2734_s28  ;;  %s3373_s12 = smov %s2592_s14 }
 0x3dd   : > { %s3374_s13 = smov %s2596_s15  ;;  %25 = sbr.rel (!%p23_p0) target bundleno = 10 (0xa), region = 200 }
 0x3df   : > { %s3375_s14 = smov %s3368_s26 }
 0x3e0   : > { %s3376_s15 = smov %s3369_s21 }
 0x3e4   :  { %1950 = vsyncpa [#allocation5], 1 }
 0x3e5   :  { %1952 = vsyncpa [#allocation5 + $0x1], 1 }
 0x3e6   :  { %1953 = vsyncpa [#allocation7], 1 }
 0x3e7   :  { %1955 = vsyncpa [#allocation7 + $0x1], 1 }

</bundles_post_ra>
